<compile_context>
chip_gen: v5e
topology: v5e:2x2
jax: 0.10.0
libtpu: 0.0.40
codegen_flags: <defaults>
</compile_context>

<pallas_src>
import jax
import jax.numpy as jnp
from jax.experimental import pallas as pl
from jax.experimental.pallas import tpu as pltpu


def _round_up(x, m):
    return (x + m - 1) // m * m


def fcnet_kernel(x_ref, w1_ref, b1_ref, w2_ref, b2_ref, w3_ref, b3_ref,
                 w4_ref, b4_ref, o_ref):
    # 4 fused MXU matmuls (bf16 operands, f32 accumulation) + f32 VPU epilogue.
    cdt = w1_ref.dtype  # compute dtype for MXU operands (bf16)

    h = jnp.dot(x_ref[...], w1_ref[...], preferred_element_type=jnp.float32)
    h = jnp.maximum(h + b1_ref[...], 0.0)                       # f32 epilogue

    h = jnp.dot(h.astype(cdt), w2_ref[...], preferred_element_type=jnp.float32)
    h = jnp.maximum(h + b2_ref[...], 0.0)

    h = jnp.dot(h.astype(cdt), w3_ref[...], preferred_element_type=jnp.float32)
    h = jnp.maximum(h + b3_ref[...], 0.0)

    out = jnp.dot(h.astype(cdt), w4_ref[...],
                  preferred_element_type=jnp.float32) + b4_ref[...]
    o_ref[...] = out.astype(o_ref.dtype)


def prepare_params(params, compute_dtype=jnp.bfloat16):
    """One-time packing (hoisted out of the per-call path).

    Pads hidden/output feature dims to lane-dense multiples of 128 and casts weights
    to the bf16 MXU operand dtype. W1's row (K) dim is NOT padded -- Mosaic handles a
    784-deep contraction natively. Biases stay f32 for the f32 epilogue.
    Returns (packed_params, feat_dim).
    """
    w1, b1, w2, b2, w3, b3, w4, b4 = params
    hid = w1.shape[1]
    feat_dim = w4.shape[1]
    hid_p = _round_up(hid, 128)      # 100 -> 128
    feat_p = _round_up(feat_dim, 128)  # 2 -> 128

    def pad2(a, rows, cols):
        a = a.reshape(-1, a.shape[-1]) if a.ndim == 2 else a.reshape(1, -1)
        return jnp.pad(a, ((0, rows - a.shape[0]), (0, cols - a.shape[1])))

    packed = (
        pad2(w1, w1.shape[0], hid_p).astype(compute_dtype),   # (in_dim, 128)
        pad2(b1, 1, hid_p).astype(jnp.float32),
        pad2(w2, hid_p, hid_p).astype(compute_dtype),          # (128, 128)
        pad2(b2, 1, hid_p).astype(jnp.float32),
        pad2(w3, hid_p, hid_p).astype(compute_dtype),          # (128, 128)
        pad2(b3, 1, hid_p).astype(jnp.float32),
        pad2(w4, hid_p, feat_p).astype(compute_dtype),         # (128, 128)
        pad2(b4, 1, feat_p).astype(jnp.float32),
    )
    return packed, feat_dim


def fc_network(x, packed_params, feat_dim, *, tile_b=256):
    """x: (B, C, H, W) or (B, in_dim). packed_params from prepare_params().
    Returns (B, feat_dim) logits (float32)."""
    w1p, b1p, w2p, b2p, w3p, b3p, w4p, b4p = packed_params
    B = x.shape[0]
    in_dim = w1p.shape[0]
    hid_p = w1p.shape[1]
    feat_p = w4p.shape[1]
    cdt = w1p.dtype

    # Single pass over x in HBM: flatten (metadata only) + cast straight to bf16.
    x2d = x.reshape(B, -1).astype(cdt)
    assert x2d.shape[1] == in_dim, "input feature dim does not match W1"

    # 128-aligned batch tile, clamped near B. No batch pad: ragged last block is
    # handled by Pallas (OOB output rows are dropped; no cross-row reductions).
    tile_b = max(128, _round_up(min(tile_b, B), 128))
    grid = (pl.cdiv(B, tile_b),)

    def batch_map(i):
        return (i, 0)

    def full_map(i):
        return (0, 0)

    # Advisory cost estimate for XLA scheduling around the custom call.
    flops = 2 * B * (in_dim * hid_p + 2 * hid_p * hid_p + hid_p * feat_p)
    weight_bytes = sum(int(a.size) * a.dtype.itemsize
                       for a in (w1p, b1p, w2p, b2p, w3p, b3p, w4p, b4p))
    bytes_accessed = (int(x2d.size) * x2d.dtype.itemsize
                      + weight_bytes
                      + B * feat_p * 4)
    cost = pl.CostEstimate(flops=flops, transcendentals=0,
                           bytes_accessed=bytes_accessed)

    out = pl.pallas_call(
        fcnet_kernel,
        out_shape=jax.ShapeDtypeStruct((B, feat_p), jnp.float32),
        grid_spec=pltpu.PrefetchScalarGridSpec(
            num_scalar_prefetch=0,
            grid=grid,
            in_specs=[
                # x tile: lane dim = full array dim (784); Mosaic lane-pads in VMEM.
                pl.BlockSpec((tile_b, in_dim), batch_map),
                pl.BlockSpec((in_dim, hid_p), full_map),   # W1 (VMEM-resident)
                pl.BlockSpec((1, hid_p), full_map),        # b1 (f32)
                pl.BlockSpec((hid_p, hid_p), full_map),    # W2
                pl.BlockSpec((1, hid_p), full_map),        # b2
                pl.BlockSpec((hid_p, hid_p), full_map),    # W3
                pl.BlockSpec((1, hid_p), full_map),        # b3
                pl.BlockSpec((hid_p, feat_p), full_map),   # W4
                pl.BlockSpec((1, feat_p), full_map),       # b4
            ],
            # Lane-dense (128-wide) output; padded cols sliced off in the wrapper.
            out_specs=pl.BlockSpec((tile_b, feat_p), batch_map),
        ),
        compiler_params=pltpu.CompilerParams(
            dimension_semantics=("parallel",)),  # megacore-shard batch tiles on v7x
        cost_estimate=cost,
    )(x2d, w1p, b1p, w2p, b2p, w3p, b3p, w4p, b4p)

    # Strip feature padding back to the logical shape.
    return out[:, :feat_dim]


def init_params(key, in_dim=784, hidden=100, feat_dim=2, dtype=jnp.float32):
    """Deterministic init mimicking torch.nn.Linear (U(-1/sqrt(fan_in), +1/sqrt(fan_in)))."""
    dims = [(in_dim, hidden), (hidden, hidden), (hidden, hidden), (hidden, feat_dim)]
    params = []
    for (fin, fout) in dims:
        key, kw, kb = jax.random.split(key, 3)
        bound = 1.0 / jnp.sqrt(jnp.asarray(fin, dtype))
        w = jax.random.uniform(kw, (fin, fout), dtype, -bound, bound)
        b = jax.random.uniform(kb, (1, fout), dtype, -bound, bound)
        params += [w, b]
    return tuple(params)


def fc_network_ref_f32(x, params):
    """Pure-JAX full-precision reference."""
    B = x.shape[0]
    h = x.reshape(B, -1)
    w1, b1, w2, b2, w3, b3, w4, b4 = params
    h = jnp.maximum(h @ w1 + b1, 0.0)
    h = jnp.maximum(h @ w2 + b2, 0.0)
    h = jnp.maximum(h @ w3 + b3, 0.0)
    return h @ w4 + b4


def fc_network_ref_matched(x, params, compute_dtype=jnp.bfloat16):
    """Pure-JAX reference with the same bf16-operand / f32-accumulate recipe as the kernel."""
    B = x.shape[0]
    h = x.reshape(B, -1)
    w1, b1, w2, b2, w3, b3, w4, b4 = params

    def dot(a, w):
        return jax.lax.dot(a.astype(compute_dtype), w.astype(compute_dtype),
                           preferred_element_type=jnp.float32)

    h = jnp.maximum(dot(h, w1) + b1, 0.0)
    h = jnp.maximum(dot(h, w2) + b2, 0.0)
    h = jnp.maximum(dot(h, w3) + b3, 0.0)
    return dot(h, w4) + b4


if __name__ == "__main__":
    key = jax.random.PRNGKey(0)
    kx, kp = jax.random.split(key)

    # Non-multiple batch exercises the ragged-last-block path; tile_b=128 gives a
    # 2-step "parallel" grid so both v7x TensorCores get work.
    B, C, H, W = 200, 1, 28, 28        # in_dim = 784 (module default)
    feat_dim = 2
    x = jax.random.normal(kx, (B, C, H, W), jnp.float32)
    params = init_params(kp, in_dim=C * H * W, hidden=100, feat_dim=feat_dim)

    # One-time packing (pad to 128 lanes + bf16 cast), hoisted out of the call path.
    packed, fd = prepare_params(params)

    logits = fc_network(x, packed, fd, tile_b=128)
    logits = jax.block_until_ready(logits)

    assert logits.shape == (B, feat_dim)

    ref_matched = fc_network_ref_matched(x, params)
    ref_f32 = fc_network_ref_f32(x, params)
    assert jnp.allclose(logits, ref_matched, atol=2e-3, rtol=2e-3), \
        "mismatch vs matched-precision JAX reference"
    assert jnp.allclose(logits, ref_f32, atol=5e-2, rtol=5e-2), \
        "mismatch vs f32 JAX reference"

    print("KERNEL_OK")
</pallas_src>

<mosaic_0001>
module attributes {stable_mosaic.version = 11 : i64} {
  func.func @fcnet_kernel(%arg0: i32, %arg1: memref<128x784xbf16, #tpu.memory_space<vmem>>, %arg2: memref<784x128xbf16, #tpu.memory_space<vmem>>, %arg3: memref<1x128xf32, #tpu.memory_space<vmem>>, %arg4: memref<128x128xbf16, #tpu.memory_space<vmem>>, %arg5: memref<1x128xf32, #tpu.memory_space<vmem>>, %arg6: memref<128x128xbf16, #tpu.memory_space<vmem>>, %arg7: memref<1x128xf32, #tpu.memory_space<vmem>>, %arg8: memref<128x128xbf16, #tpu.memory_space<vmem>>, %arg9: memref<1x128xf32, #tpu.memory_space<vmem>>, %arg10: memref<128x128xf32, #tpu.memory_space<vmem>>) attributes {dimension_semantics = [#tpu.dimension_semantics<parallel>], iteration_bounds = array<i64: 2>, scalar_prefetch = 0 : i64, scratch_operands = 0 : i64, tpu.core_type = #tpu.core_type<tc>, window_params = [{transform_indices = @transform_0, window_bounds = array<i64: 128, 784>}, {pipeline_mode = #tpu.pipeline_mode<synchronous>, transform_indices = @transform_1, window_bounds = array<i64: 784, 128>}, {pipeline_mode = #tpu.pipeline_mode<synchronous>, transform_indices = @transform_2, window_bounds = array<i64: 1, 128>}, {pipeline_mode = #tpu.pipeline_mode<synchronous>, transform_indices = @transform_3, window_bounds = array<i64: 128, 128>}, {pipeline_mode = #tpu.pipeline_mode<synchronous>, transform_indices = @transform_4, window_bounds = array<i64: 1, 128>}, {pipeline_mode = #tpu.pipeline_mode<synchronous>, transform_indices = @transform_5, window_bounds = array<i64: 128, 128>}, {pipeline_mode = #tpu.pipeline_mode<synchronous>, transform_indices = @transform_6, window_bounds = array<i64: 1, 128>}, {pipeline_mode = #tpu.pipeline_mode<synchronous>, transform_indices = @transform_7, window_bounds = array<i64: 128, 128>}, {pipeline_mode = #tpu.pipeline_mode<synchronous>, transform_indices = @transform_8, window_bounds = array<i64: 1, 128>}, {transform_indices = @transform_9, window_bounds = array<i64: 128, 128>}]} {
    %c0 = arith.constant 0 : index
    %c0_0 = arith.constant 0 : index
    %0 = vector.load %arg1[%c0, %c0_0] : memref<128x784xbf16, #tpu.memory_space<vmem>>, vector<128x784xbf16>
    %c0_1 = arith.constant 0 : index
    %c0_2 = arith.constant 0 : index
    %1 = vector.load %arg2[%c0_1, %c0_2] : memref<784x128xbf16, #tpu.memory_space<vmem>>, vector<784x128xbf16>
    %cst = arith.constant dense<0.000000e+00> : vector<128x128xf32>
    %2 = tpu.matmul %0, %1, %cst {dimension_numbers = #tpu.dot_dimension_numbers<[1], [0], [0], [1], [0, 0, 1, 1], [], []>} : vector<128x784xbf16>, vector<784x128xbf16>, vector<128x128xf32> -> vector<128x128xf32>
    %c0_3 = arith.constant 0 : index
    %c0_4 = arith.constant 0 : index
    %3 = vector.load %arg3[%c0_3, %c0_4] : memref<1x128xf32, #tpu.memory_space<vmem>>, vector<1x128xf32>
    %4 = vector.broadcast %3 : vector<1x128xf32> to vector<128x128xf32>
    %5 = arith.addf %2, %4 : vector<128x128xf32>
    %cst_5 = arith.constant 0.000000e+00 : f32
    %6 = vector.broadcast %cst_5 : f32 to vector<128x128xf32>
    %7 = arith.maximumf %5, %6 : vector<128x128xf32>
    %8 = arith.truncf %7 : vector<128x128xf32> to vector<128x128xbf16>
    %c0_6 = arith.constant 0 : index
    %c0_7 = arith.constant 0 : index
    %9 = vector.load %arg4[%c0_6, %c0_7] : memref<128x128xbf16, #tpu.memory_space<vmem>>, vector<128x128xbf16>
    %cst_8 = arith.constant dense<0.000000e+00> : vector<128x128xf32>
    %10 = tpu.matmul %8, %9, %cst_8 {dimension_numbers = #tpu.dot_dimension_numbers<[1], [0], [0], [1], [0, 0, 1, 1], [], []>} : vector<128x128xbf16>, vector<128x128xbf16>, vector<128x128xf32> -> vector<128x128xf32>
    %c0_9 = arith.constant 0 : index
    %c0_10 = arith.constant 0 : index
    %11 = vector.load %arg5[%c0_9, %c0_10] : memref<1x128xf32, #tpu.memory_space<vmem>>, vector<1x128xf32>
    %12 = vector.broadcast %11 : vector<1x128xf32> to vector<128x128xf32>
    %13 = arith.addf %10, %12 : vector<128x128xf32>
    %cst_11 = arith.constant 0.000000e+00 : f32
    %14 = vector.broadcast %cst_11 : f32 to vector<128x128xf32>
    %15 = arith.maximumf %13, %14 : vector<128x128xf32>
    %16 = arith.truncf %15 : vector<128x128xf32> to vector<128x128xbf16>
    %c0_12 = arith.constant 0 : index
    %c0_13 = arith.constant 0 : index
    %17 = vector.load %arg6[%c0_12, %c0_13] : memref<128x128xbf16, #tpu.memory_space<vmem>>, vector<128x128xbf16>
    %cst_14 = arith.constant dense<0.000000e+00> : vector<128x128xf32>
    %18 = tpu.matmul %16, %17, %cst_14 {dimension_numbers = #tpu.dot_dimension_numbers<[1], [0], [0], [1], [0, 0, 1, 1], [], []>} : vector<128x128xbf16>, vector<128x128xbf16>, vector<128x128xf32> -> vector<128x128xf32>
    %c0_15 = arith.constant 0 : index
    %c0_16 = arith.constant 0 : index
    %19 = vector.load %arg7[%c0_15, %c0_16] : memref<1x128xf32, #tpu.memory_space<vmem>>, vector<1x128xf32>
    %20 = vector.broadcast %19 : vector<1x128xf32> to vector<128x128xf32>
    %21 = arith.addf %18, %20 : vector<128x128xf32>
    %cst_17 = arith.constant 0.000000e+00 : f32
    %22 = vector.broadcast %cst_17 : f32 to vector<128x128xf32>
    %23 = arith.maximumf %21, %22 : vector<128x128xf32>
    %24 = arith.truncf %23 : vector<128x128xf32> to vector<128x128xbf16>
    %c0_18 = arith.constant 0 : index
    %c0_19 = arith.constant 0 : index
    %25 = vector.load %arg8[%c0_18, %c0_19] : memref<128x128xbf16, #tpu.memory_space<vmem>>, vector<128x128xbf16>
    %cst_20 = arith.constant dense<0.000000e+00> : vector<128x128xf32>
    %26 = tpu.matmul %24, %25, %cst_20 {dimension_numbers = #tpu.dot_dimension_numbers<[1], [0], [0], [1], [0, 0, 1, 1], [], []>} : vector<128x128xbf16>, vector<128x128xbf16>, vector<128x128xf32> -> vector<128x128xf32>
    %c0_21 = arith.constant 0 : index
    %c0_22 = arith.constant 0 : index
    %27 = vector.load %arg9[%c0_21, %c0_22] : memref<1x128xf32, #tpu.memory_space<vmem>>, vector<1x128xf32>
    %28 = vector.broadcast %27 : vector<1x128xf32> to vector<128x128xf32>
    %29 = arith.addf %26, %28 : vector<128x128xf32>
    %c0_23 = arith.constant 0 : index
    %c0_24 = arith.constant 0 : index
    %30 = vector.load %arg10[%c0_23, %c0_24] : memref<128x128xf32, #tpu.memory_space<vmem>>, vector<128x128xf32>
    tpu.vector_store %arg10[%c0_23, %c0_24], %29 {strides = array<i32>} : memref<128x128xf32, #tpu.memory_space<vmem>>, vector<128x128xf32>,
    return
  }
  func.func @transform_0(%arg0: i32) -> (i32, i32) {
    %c0_i32 = arith.constant 0 : i32
    %c0_i32_0 = arith.constant 0 : i32
    return %arg0, %c0_i32 : i32, i32
  }
  func.func @transform_1(%arg0: i32) -> (i32, i32) {
    %c0_i32 = arith.constant 0 : i32
    %c0_i32_0 = arith.constant 0 : i32
    %c0_i32_1 = arith.constant 0 : i32
    return %c0_i32, %c0_i32_0 : i32, i32
  }
  func.func @transform_2(%arg0: i32) -> (i32, i32) {
    %c0_i32 = arith.constant 0 : i32
    %c0_i32_0 = arith.constant 0 : i32
    %c0_i32_1 = arith.constant 0 : i32
    return %c0_i32, %c0_i32_0 : i32, i32
  }
  func.func @transform_3(%arg0: i32) -> (i32, i32) {
    %c0_i32 = arith.constant 0 : i32
    %c0_i32_0 = arith.constant 0 : i32
    %c0_i32_1 = arith.constant 0 : i32
    return %c0_i32, %c0_i32_0 : i32, i32
  }
  func.func @transform_4(%arg0: i32) -> (i32, i32) {
    %c0_i32 = arith.constant 0 : i32
    %c0_i32_0 = arith.constant 0 : i32
    %c0_i32_1 = arith.constant 0 : i32
    return %c0_i32, %c0_i32_0 : i32, i32
  }
  func.func @transform_5(%arg0: i32) -> (i32, i32) {
    %c0_i32 = arith.constant 0 : i32
    %c0_i32_0 = arith.constant 0 : i32
    %c0_i32_1 = arith.constant 0 : i32
    return %c0_i32, %c0_i32_0 : i32, i32
  }
  func.func @transform_6(%arg0: i32) -> (i32, i32) {
    %c0_i32 = arith.constant 0 : i32
    %c0_i32_0 = arith.constant 0 : i32
    %c0_i32_1 = arith.constant 0 : i32
    return %c0_i32, %c0_i32_0 : i32, i32
  }
  func.func @transform_7(%arg0: i32) -> (i32, i32) {
    %c0_i32 = arith.constant 0 : i32
    %c0_i32_0 = arith.constant 0 : i32
    %c0_i32_1 = arith.constant 0 : i32
    return %c0_i32, %c0_i32_0 : i32, i32
  }
  func.func @transform_8(%arg0: i32) -> (i32, i32) {
    %c0_i32 = arith.constant 0 : i32
    %c0_i32_0 = arith.constant 0 : i32
    %c0_i32_1 = arith.constant 0 : i32
    return %c0_i32, %c0_i32_0 : i32, i32
  }
  func.func @transform_9(%arg0: i32) -> (i32, i32) {
    %c0_i32 = arith.constant 0 : i32
    %c0_i32_0 = arith.constant 0 : i32
    return %arg0, %c0_i32 : i32, i32
  }
}

</mosaic_0001>

<bundles_post_ra>
// kernel: tpu_custom_call.1
= control target key start
LH: loop header
LB: loop body
LE: loop exit
PB: predicated region body
PF: predicated region fallthrough
CT: control target
= control target key end

     0   :  { %s3745_s0 = inlined_call_operand.hbm [shape: bf16[200,784], index: 0, kind: input, shape index: {}]   ;;  %s3746_s1 = inlined_call_operand.hbm [shape: bf16[784,128], index: 1, kind: input, shape index: {}]   ;;  %s3747_s2 = inlined_call_operand.vmem [shape: f32[1,128], index: 2, kind: input, shape index: {}]   ;;  %s3748_s3 = inlined_call_operand.hbm [shape: bf16[128,128], index: 3, kind: input, shape index: {}]   ;;  %s3749_s4 = inlined_call_operand.vmem [shape: f32[1,128], index: 4, kind: input, shape index: {}]   ;;  %s3750_s5 = inlined_call_operand.hbm [shape: bf16[128,128], index: 5, kind: input, shape index: {}]   ;;  %s3751_s6 = inlined_call_operand.vmem [shape: f32[1,128], index: 6, kind: input, shape index: {}]   ;;  %s3752_s7 = inlined_call_operand.hbm [shape: bf16[128,128], index: 7, kind: input, shape index: {}]   ;;  %s3753_s8 = inlined_call_operand.vmem [shape: f32[1,128], index: 8, kind: input, shape index: {}]   ;;  %s3754_s9 = inlined_call_operand.hbm [shape: f32[200,128], index: 9, kind: output, shape index: {}]  }
   0x1   :  { %3762 = sst [smem:[#allocation20_spill]] %s3746_s1 }
   0x2   :  { %3763 = sst [smem:[#allocation21_spill]] %s3750_s5 }
   0x3   :  { %3764 = sst [smem:[#allocation22_spill]] %s3754_s9 }
   0x4   :  { %14 = vsyncpa [#allocation3], 0 }
   0x5   :  { %16 = vsyncpa [#allocation3 + $0x1], 0 }
   0x6   :  { %17 = vsyncpa [#allocation6], 0 }
   0x7   :  { %18 = vsyncpa [#allocation9], 0 }
   0x8   :  { %19 = vsyncpa [#allocation4], 0 }
   0x9   :  { %21 = vsyncpa [#allocation4 + $0x1], 0  ;;  %s3221_s30 = smov 0   ;;  %s3223_s10 = smov 0  }
   0xa   :  { %s3225_s11 = smov 0   ;;  %s3227_s12 = smov 0  }
   0xb LB: > { %3765 = sst [smem:[#allocation16_spill]] %s3145_s30  ;;  %s3242_s13 = sadd.s32 4294967295, %s3157_s12   ;;  %s3157_s12 = sphi %s3227_s12, %s3788_s12   ;;  %s3153_s11 = sphi %s3225_s11, %s3792_s11   ;;  %s3149_s10 = sphi %s3223_s10, %s3791_s10   ;;  %s3145_s30 = sphi %s3221_s30, %s3790_s30  }
   0xc   : > { %s2121_s14 = sadd.s32 4294967294, %s3157_s12   ;;  %s3246_s15 = sadd.s32 1, %s3157_s12  }
   0xd   : > { %3766 = sst [smem:[#allocation17_spill]] %s3246_s15  ;;  %s34_s16 = sadd.s32 1, %s3153_s11 }
   0xe   : > { %s31_s17 = ssub.s32 %s3157_s12, %s3246_s15  ;;  %p41_p0 = scmp.ne.s32.totalorder %s3153_s11, %s3149_s10 }
   0xf   : > { %p32_p1 = scmp.eq.s32.totalorder %s31_s17, 0  ;;  %p42_p2 = scmp.eq.s32.totalorder %s3157_s12, 0 }
  0x10   : > { %p47_p3 = scmp.ne.s32.totalorder %s3149_s10, %s3145_s30  ;;  %p3761_p4 = scmp.eq.s32.totalorder %s3242_s13, 0 }
  0x11   : > { %s3258_s18 = scalar_select %p32_p1, %s3153_s11, %s34_s16  }
  0x12   : > { %p3260_p5 = por %p42_p2, %p41_p0  ;;  %p3266_p6 = por %p3761_p4, %p47_p3 }
  0x13   : > { %3767 = sst [smem:[#allocation18_spill]] %s3258_s18  ;;  %p239_p7 = scmp.eq.s32.totalorder %s3242_s13, 1 }
  0x14   : > { %p245_p8 = scmp.eq.s32.totalorder %s2121_s14, 1  ;;  %p2122_p9 = scmp.ge.s32.totalorder %s3157_s12, 1 }
  0x15   : > { %p252_p10 = scmp.lt.s32.totalorder %s3157_s12, 3  ;;  %p3273_p11 = por %p239_p7, %p41_p0 }
  0x16   : > { %p3277_p12 = por %p245_p8, %p47_p3  ;;  %s3774_s1 = sld [smem:[#allocation20_spill]] }
  0x17   : > { %p3281_p13 = pnand %p2122_p9, %p252_p10  ;;  %s3159_s27 = smov [#allocation5]  }
  0x18   : > { %s3771_s22 = scalar_select %p3277_p12, 1, 0 }
  0x19   : > { %p2841_p1 = pneg %p3281_p13  ;;  %s265_s28 = sshll.u32 %s3159_s27, 4  ;;  %s266_s28 = int_to_ptr.vmem [resolvable:$true] %s265_s28 }
  0x1a   : > { %3772 = sst [smem:[#allocation19_spill]] %s3771_s22  ;;  %s3160_s24 = smov 64  }
  0x1b   : > { %p3292_p0 = pnand %p2841_p1, %p3761_p4  ;;  %s3776_s5 = sld [smem:[#allocation21_spill]] }
  0x1c   : > { %s263_s26 = sshll.u32 %s3774_s1, 4  ;;  %s3161_s25 = smov 4   ;;  %s264_s26 = int_to_ptr.hbm [resolvable:$true] %s263_s26 }
  0x1d   : > { %2844 = dma.hbm_to_vmem [thread:$0]  (!%p3292_p0), %s264_s26, 6272, %s266_s28, [#allocation6], %s3160_s24, %s3160_s24, %s3161_s25  }
  0x1e   : > { %s280_s18 = sshll.u32 %s3748_s3, 4  ;;  %s3162_s15 = smov [#allocation8]   ;;  %s281_s18 = int_to_ptr.hbm [resolvable:$true] %s280_s18 }
  0x1f   : > { %s299_s22 = sshll.u32 %s3162_s15, 4  ;;  %s3163_s14 = smov [#allocation7]   ;;  %s300_s22 = int_to_ptr.vmem [resolvable:$true] %s299_s22 }
  0x20   : > { %s282_s16 = sshll.u32 %s3163_s14, 4  ;;  %s314_s9 = sshll.u32 %s3752_s7, 4  ;;  %s283_s16 = int_to_ptr.vmem [resolvable:$true] %s282_s16  ;;  %s315_s9 = int_to_ptr.hbm [resolvable:$true] %s314_s9 }
  0x21   : > { %s297_s17 = sshll.u32 %s3776_s5, 4  ;;  %s3164_s26 = smov [#allocation10]   ;;  %s298_s17 = int_to_ptr.hbm [resolvable:$true] %s297_s17 }
  0x22   : > { %2850 = dma.hbm_to_vmem [thread:$0]  (!%p3292_p0), %s298_s17, 1024, %s300_s22, [#allocation9], %s3160_s24, %s3160_s24, %s3161_s25  }
  0x23   : > { %2847 = dma.hbm_to_vmem [thread:$0]  (!%p3292_p0), %s281_s18, 1024, %s283_s16, [#allocation6], %s3160_s24, %s3160_s24, %s3161_s25  }
  0x24   : > { %s316_s1 = sshll.u32 %s3164_s26, 4  ;;  %p3760_p2 = scmp.ge.s32.totalorder %s3157_s12, 2  ;;  %s317_s1 = int_to_ptr.vmem [resolvable:$true] %s316_s1 }
  0x25   : > { %2853 = dma.hbm_to_vmem [thread:$0]  (!%p3292_p0), %s315_s9, 1024, %s317_s1, [#allocation9], %s3160_s24, %s3160_s24, %s3161_s25  }
  0x26   : > { %329 = sbr.rel (%p3760_p2) target bundleno = 84 (0x54), region = 48 }
  0x2b   : > { %332 = sbr.rel (!%p3260_p5) target bundleno = 84 (0x54), region = 52  ;;  %s333_s5 = sand.u32 (%p3260_p5), 1, %s3153_s11  }
  0x2c   : > { %s2128_s30 = sshll.u32 (%p3260_p5), %s3157_s12, 4  ;;  %s2820_s15 = smul.u32 (%p3260_p5), 448, %s333_s5 }
  0x2d   : > { %s339_s18 = ssub.s32 (%p3260_p5), 25, %s2128_s30  ;;  %s3320_s9 = scalar_lea.sflag (%p3260_p5), [#allocation3], %s333_s5 }
  0x2e   : > { %p340_p3 = scmp.lt.s32.totalorder (%p3260_p5), %s339_s18, 16  ;;  %s337_s17 = scalar_lea.vmem (%p3260_p5), [#allocation2], %s2820_s15 }
  0x30   : > { %s3794_s18 = smov (!%p340_p3, %s339_s18), 16 }
  0x31   : > { %s2130_s22 = smul.u32 28, %s3794_s18 }
  0x33   : > { %s344_s28 = ssub.s32 448, %s2130_s22 }
  0x34   : > { %s345_s29 = sshll.u32 %s344_s28, 4 }
  0x35   : > { %346 = vsyncadd %s3320_s9, %s345_s29  ;;  %p3323_p7 = scmp.ne.s32.totalorder %s2130_s22, 0  ;;  %s2821_s24 = smul.u32 448, %s3157_s12 }
  0x36   : > { %s3328_s25 = sshll.u32 %s337_s17, 4  ;;  %s3330_s27 = smul.u32 448, %s3794_s18  ;;  %s355_s25 = int_to_ptr.vmem [resolvable:$true] %s3328_s25 }
  0x37   : > { %s350_s26 = scalar_lea.hbm %s3745_s0, %s2821_s24  ;;  %s3044_s17 = scalar_lea.hbm %s3745_s0, 700 }
  0x38   : > { %s352_s1 = sshll.u32 %s350_s26, 4  ;;  %s3035_s30 = sshrl.u32 %s3330_s27, 4  ;;  %s3336_s1 = int_to_ptr.hbm [resolvable:$true] %s352_s1 }
  0x39   : > { %s3033_s5 = sshra.s32 %s3336_s1, 4  ;;  %s3071_s15 = sshll.u32 %s3035_s30, 4  ;;  %s3034_s5 = int_to_ptr.hbm [resolvable:$true] %s3033_s5 }
  0x3a   : > { %p3037_p5 = scmp.ne.s32.totalorder %s3071_s15, %s3330_s27  ;;  %s3038_s22 = sadd.s32 1, %s3035_s30 }
  0x3b   : > { %p3045_p1 = scmp.lt.s32.totalorder %s3034_s5, %s3745_s0 }
  0x3c   : > { %s3796_s22 = smov (!%p3037_p5, %s3038_s22), %s3035_s30 }
  0x3d   : > { %s3040_s18 = scalar_lea.hbm %s3034_s5, %s3796_s22 }
  0x3e   : > { %p3041_p8 = scmp.ne.s32.totalorder %s3034_s5, %s3040_s18  ;;  %p3046_p0 = scmp.lt.s32.totalorder %s3044_s17, %s3040_s18 }
  0x40   : > { %p3042_p9 = pnand %p3041_p8, %p3323_p7  ;;  %p3047_p3 = por %p3046_p0, %p3045_p1 }
  0x42   : > { %p3043_p10 = pneg %p3042_p9 }
  0x44   : > { %p3048_p2 = pnand %p3047_p3, %p3043_p10 }
  0x46   : > { %3051 = shalt.err (!%p3048_p2)
}
  0x47   : > { %s3052_s16 = sshra.s32 %s355_s25, 4  ;;  %s3165_s30 = smov [#allocation2]   ;;  %s3053_s16 = int_to_ptr.vmem [resolvable:$true] %s3052_s16 }
  0x48   : > { %s3059_s26 = scalar_lea.vmem %s3053_s16, %s3796_s22  ;;  %s3063_s15 = scalar_lea.vmem %s3165_s30, 896 }
  0x49   : > { %p3060_p5 = scmp.ne.s32.totalorder %s3053_s16, %s3059_s26  ;;  %p3065_p4 = scmp.lt.s32.totalorder %s3063_s15, %s3059_s26 }
  0x4b   : > { %p3061_p8 = pnand %p3060_p5, %p3323_p7 }
  0x4d   : > { %p3062_p9 = pneg %p3061_p8 }
  0x4f   : > { %p3067_p12 = pnand %p3065_p4, %p3062_p9 }
  0x51   : > { %3070 = shalt.err (!%p3067_p12)
}
  0x52   : > { %s3166_s5 = smov 448   ;;  %s3167_s18 = smov 28  }
  0x53   : > { %360 = dma.hbm_to_vmem [thread:$0]  (%p3323_p7), %s3336_s1, %s3330_s27, %s355_s25, %s3320_s9, %s3166_s5, %s3166_s5, %s3167_s18  }
  0x54 PF: > { %366 = sbr.rel (%p3281_p13) target bundleno = 1032 (0x408), region = 56  ;;  %s3363_s22 = sand.u32 (!%p3281_p13), 1, %s3149_s10  }
  0x55   : > { %s2822_s28 = smul.u32 (!%p3281_p13), 448, %s3363_s22  ;;  %s369_s29 = scalar_lea.sflag (!%p3281_p13), [#allocation3], %s3363_s22 }
  0x57   : > { %s3367_s17 = scalar_lea.vmem (!%p3281_p13), [#allocation2], %s2822_s28 }
  0x59   : > { %3128 = dma.done.wait (%p3266_p6), %s369_s29, 7168  }
  0x5a   : > { %3130 = vsyncadd (%p3266_p6), %s369_s29, 4294960128  ;;  %p3778_p4 = scmp.eq.s32.totalorder %s3242_s13, 0 }
  0x5c   : > { %3132 = dma.done.wait (%p3778_p4), [#allocation6], 7296   ;;  %p3779_p12 = pmov %p3778_p4 }
  0x5d   : > { %p3780_p13 = pmov %p3778_p4 }
  0x5e   : > { %3134 = vsyncadd (%p3779_p12), [#allocation6], 4294960000 }
  0x5f   : > { %3136 = dma.done.wait (%p3780_p13), [#allocation9], 2048   ;;  %p3781_p2 = pmov %p3778_p4 }
  0x60   : > { %v2737_v0 = vld [vmem:[#allocation5 + $0x38] sm:$0xff]  ;;  %v2736_v2 = vld [vmem:[#allocation5 + $0x30] sm:$0xff]  ;;  %v2735_v4 = vld [vmem:[#allocation5 + $0x28] sm:$0xff]  ;;  %vm1180_vm0 = vcmask 130048   ;;  %s2140_s1 = sshll.u32 %s3363_s22, 7  ;;  %s1988_s26 = scalar_lea.sflag [#allocation4], %s3363_s22 }
  0x61   : > { %3138 = vsyncadd (%p3781_p2), [#allocation9], 4294965248  ;;  %v2745_v1 = vld [vmem:[#allocation5 + $0x78] sm:$0xff]  ;;  %2804 = vmatpush.bf16.msra.mxu2 %v2737_v0  ;;  %v2744_v3 = vld [vmem:[#allocation5 + $0x70] sm:$0xff]  ;;  %1205 = vmatpush.bf16.msra.mxu0 %v2737_v0  ;;  %s3664_s16 = scalar_lea.vmem [#allocation11], %s2140_s1  ;;  %s2666_s30 = sshll.u32 (%p3273_p11), %s3242_s13, 4 }
  0x62   : > { %2812 = vmatpush.bf16.msra.mxu3 %v2745_v1  ;;  %1254 = vmatpush.bf16.msra.mxu1 %v2745_v1  ;;  %v2743_v5 = vld [vmem:[#allocation5 + $0x68] sm:$0xff]  ;;  %v2734_v6 = vld [vmem:[#allocation5 + $0x20] sm:$0xff]  ;;  %v2733_v8 = vld [vmem:[#allocation5 + $0x18] sm:$0xff]  ;;  %s1996_s15 = ssub.s32 (%p3273_p11), 25, %s2666_s30 }
  0x63   : > { %v2742_v7 = vld [vmem:[#allocation5 + $0x60] sm:$0xff]  ;;  %v2741_v9 = vld [vmem:[#allocation5 + $0x58] sm:$0xff]  ;;  %v2732_v10 = vld [vmem:[#allocation5 + $0x10] sm:$0xff]  ;;  %p1997_p6 = scmp.lt.s32.totalorder (%p3273_p11), %s1996_s15, 16 }
  0x64   : > { %v2740_v11 = vld [vmem:[#allocation5 + $0x50] sm:$0xff]  ;;  %v2731_v12 = vld [vmem:[#allocation5 + $0x8] sm:$0xff]  ;;  %v2730_v14 = vld [vmem:[#allocation5] sm:$0xff] }
  0x65   : > { %2805 = vmatpush.bf16.msra.mxu2 %v2736_v2  ;;  %1206 = vmatpush.bf16.msra.mxu0 %v2736_v2  ;;  %v2739_v13 = vld [vmem:[#allocation5 + $0x48] sm:$0xff]  ;;  %v2738_v15 = vld [vmem:[#allocation5 + $0x40] sm:$0xff]  ;;  %v2705_v17 = vld [vmem:[%s3367_s17 + $0xf8] sm:$0xf0] }
  0x66   : > { %2813 = vmatpush.bf16.msra.mxu3 %v2744_v3  ;;  %1255 = vmatpush.bf16.msra.mxu1 %v2744_v3  ;;  %v2255_v16 = vld [vmem:[%s3367_s17 + $0xe0] sm:$0xf]  ;;  %v2702_v18 = vld [vmem:[%s3367_s17 + $0xe4] sm:$0xf]  ;;  %v2753_v20 = vld [vmem:[#allocation5 + $0xb8] sm:$0xff] }
  0x67   : > { %v2257_v19 = vld [vmem:[%s3367_s17 + $0xfc] sm:$0xf0]  ;;  %v2677_v22 = vld [vmem:[%s3367_s17 + $0x18] sm:$0xf0]  ;;  %v2674_v23 = vld [vmem:[%s3367_s17 + $0x4] sm:$0xf]  ;;  %v2256_v25 = vor.u32 %v2705_v17, %v2255_v16 }
  0x68   : > { %v2143_v21 = vld [vmem:[%s3367_s17] sm:$0xf]  ;;  %v2260_v26 = vor.u32 %v2702_v18, %v2257_v19  ;;  %v2752_v28 = vld [vmem:[#allocation5 + $0xb0] sm:$0xff]  ;;  %v2761_v30 = vld [vmem:[#allocation5 + $0xf8] sm:$0xff] }
  0x69   : > { %2806 = vmatpush.bf16.msra.mxu2 %v2735_v4  ;;  %1207 = vmatpush.bf16.msra.mxu0 %v2735_v4  ;;  %v2145_v24 = vld [vmem:[%s3367_s17 + $0x1c] sm:$0xf0]  ;;  %v2144_v27 = vor.u32 %v2677_v22, %v2143_v21  ;;  %v2751_v31 = vld [vmem:[#allocation5 + $0xa8] sm:$0xff]  ;;  %v2769_v32 = vld [vmem:[#allocation5 + $0x138] sm:$0xff] }
  0x6a   : > { %2814 = vmatpush.bf16.msra.mxu3 %v2743_v5  ;;  %1256 = vmatpush.bf16.msra.mxu1 %v2743_v5  ;;  %v2148_v29 = vor.u32 %v2674_v23, %v2145_v24  ;;  %v2760_v33 = vld [vmem:[#allocation5 + $0xf0] sm:$0xff]  ;;  %v2777_v34 = vld [vmem:[#allocation5 + $0x178] sm:$0xff]  ;;  %v2750_v36 = vld [vmem:[#allocation5 + $0xa0] sm:$0xff] }
  0x6b   : > { %v2768_v35 = vld [vmem:[#allocation5 + $0x130] sm:$0xff]  ;;  %v2759_v37 = vld [vmem:[#allocation5 + $0xe8] sm:$0xff]  ;;  %v2283_v38 = vld [vmem:[%s3367_s17 + $0x118] sm:$0xf] }
  0x6c   : > { %v2712_v39 = vld [vmem:[%s3367_s17 + $0x130] sm:$0xf0]  ;;  %v2709_v40 = vld [vmem:[%s3367_s17 + $0x11c] sm:$0xf]  ;;  %v2285_v41 = vld [vmem:[%s3367_s17 + $0x134] sm:$0xf0] }
  0x6d   : > { %2807 = vmatpush.bf16.msra.mxu2 %v2734_v6  ;;  %1208 = vmatpush.bf16.msra.mxu0 %v2734_v6  ;;  %v2171_v42 = vld [vmem:[%s3367_s17 + $0x38] sm:$0xf]  ;;  %v2684_v43 = vld [vmem:[%s3367_s17 + $0x50] sm:$0xf0]  ;;  %v2681_v45 = vld [vmem:[%s3367_s17 + $0x3c] sm:$0xf]  ;;  %v2284_v48 = vor.u32 %v2712_v39, %v2283_v38  ;;  %v2288_v49 = vor.u32 %v2709_v40, %v2285_v41 }
  0x6e   : > { %2815 = vmatpush.bf16.msra.mxu3 %v2742_v7  ;;  %1257 = vmatpush.bf16.msra.mxu1 %v2742_v7  ;;  %v2749_v44 = vld [vmem:[#allocation5 + $0x98] sm:$0xff]  ;;  %v2758_v47 = vld [vmem:[#allocation5 + $0xe0] sm:$0xff]  ;;  %v2172_v50 = vor.u32 %v2684_v43, %v2171_v42  ;;  %v2748_v52 = vld [vmem:[#allocation5 + $0x90] sm:$0xff] }
  0x6f   : > { %v2173_v46 = vld [vmem:[%s3367_s17 + $0x54] sm:$0xf0]  ;;  %v2776_v53 = vld [vmem:[#allocation5 + $0x170] sm:$0xff]  ;;  %v2767_v55 = vld [vmem:[#allocation5 + $0x128] sm:$0xff] }
  0x70   : > { %v2176_v51 = vor.u32 %v2681_v45, %v2173_v46  ;;  %v2757_v54 = vld [vmem:[#allocation5 + $0xd8] sm:$0xff]  ;;  %v2775_v56 = vld [vmem:[#allocation5 + $0x168] sm:$0xff]  ;;  %v2756_v58 = vld [vmem:[#allocation5 + $0xd0] sm:$0xff] }
  0x71   : > { %2808 = vmatpush.bf16.msra.mxu2 %v2733_v8  ;;  %1209 = vmatpush.bf16.msra.mxu0 %v2733_v8  ;;  %v2747_v57 = vld [vmem:[#allocation5 + $0x88] sm:$0xff]  ;;  %v2766_v59 = vld [vmem:[#allocation5 + $0x120] sm:$0xff]  ;;  %v2765_v63 = vld [vmem:[#allocation5 + $0x118] sm:$0xff] }
  0x72   : > { %2816 = vmatpush.bf16.msra.mxu3 %v2741_v9  ;;  %1258 = vmatpush.bf16.msra.mxu1 %v2741_v9  ;;  %v2774_v60 = vld [vmem:[#allocation5 + $0x160] sm:$0xff]  ;;  %v2755_v62 = vld [vmem:[#allocation5 + $0xc8] sm:$0xff]  ;;  %v2311_v0 = vld [vmem:[%s3367_s17 + $0x150] sm:$0xf] }
  0x73   : > { %v2746_v61 = vld [vmem:[#allocation5 + $0x80] sm:$0xff]  ;;  %v2719_v1 = vld [vmem:[%s3367_s17 + $0x168] sm:$0xf0]  ;;  %v2716_v2 = vld [vmem:[%s3367_s17 + $0x154] sm:$0xf] }
  0x74   : > { %v2313_v3 = vld [vmem:[%s3367_s17 + $0x16c] sm:$0xf0]  ;;  %v2773_v4 = vld [vmem:[#allocation5 + $0x158] sm:$0xff]  ;;  %v2691_v6 = vld [vmem:[%s3367_s17 + $0x88] sm:$0xf0] }
  0x75   : > { %2809 = vmatpush.bf16.msra.mxu2 %v2732_v10  ;;  %1210 = vmatpush.bf16.msra.mxu0 %v2732_v10  ;;  %v2199_v5 = vld [vmem:[%s3367_s17 + $0x70] sm:$0xf]  ;;  %v2688_v7 = vld [vmem:[%s3367_s17 + $0x74] sm:$0xf]  ;;  %v2754_v9 = vld [vmem:[#allocation5 + $0xc0] sm:$0xff] }
  0x76   : > { %2817 = vmatpush.bf16.msra.mxu3 %v2740_v11  ;;  %1259 = vmatpush.bf16.msra.mxu1 %v2740_v11  ;;  %v2201_v8 = vld [vmem:[%s3367_s17 + $0x8c] sm:$0xf0]  ;;  %v2312_v11 = vor.u32 %v2719_v1, %v2311_v0  ;;  %v2778_v16 = vld [vmem:[#allocation5 + $0x180] sm:$0xff]  ;;  %v2763_v17 = vld [vmem:[#allocation5 + $0x108] sm:$0xff] }
  0x77   : > { %v2764_v10 = vld [vmem:[#allocation5 + $0x110] sm:$0xff]  ;;  %v2771_v18 = vld [vmem:[#allocation5 + $0x148] sm:$0xff]  ;;  %v2762_v19 = vld [vmem:[#allocation5 + $0x100] sm:$0xff] }
  0x78   : > { %v2339_v21 = vld [vmem:[%s3367_s17 + $0x188] sm:$0xf]  ;;  %v2726_v22 = vld [vmem:[%s3367_s17 + $0x1a0] sm:$0xf0]  ;;  %v2723_v23 = vld [vmem:[%s3367_s17 + $0x18c] sm:$0xf] }
  0x79   : > { %2810 = vmatpush.bf16.msra.mxu2 %v2731_v12  ;;  %1211 = vmatpush.bf16.msra.mxu0 %v2731_v12  ;;  %v2316_v12 = vor.u32 %v2716_v2, %v2313_v3  ;;  %v2341_v24 = vld [vmem:[%s3367_s17 + $0x1a4] sm:$0xf0]  ;;  %v2679_v38 = vld [vmem:[%s3367_s17 + $0x28] sm:$0xf0]  ;;  %v2676_v39 = vld [vmem:[%s3367_s17 + $0x14] sm:$0xf] }
  0x7a   : > { %2818 = vmatpush.bf16.msra.mxu3 %v2739_v13  ;;  %1260 = vmatpush.bf16.msra.mxu1 %v2739_v13  ;;  %v2200_v13 = vor.u32 %v2691_v6, %v2199_v5  ;;  %v2161_v40 = vld [vmem:[%s3367_s17 + $0x2c] sm:$0xf0]  ;;  %v2179_v45 = vld [vmem:[%s3367_s17 + $0x40] sm:$0xf]  ;;  %v2685_v46 = vld [vmem:[%s3367_s17 + $0x58] sm:$0xf0] }
  0x7b   : > { %v2217_v0 = vld [vmem:[%s3367_s17 + $0x9c] sm:$0xf0]  ;;  %v2235_v5 = vld [vmem:[%s3367_s17 + $0xb0] sm:$0xf]  ;;  %v2699_v6 = vld [vmem:[%s3367_s17 + $0xc8] sm:$0xf0] }
  0x7d   : > { %2811 = vmatpush.bf16.msra.mxu2 %v2730_v14  ;;  %1212 = vmatpush.bf16.msra.mxu0 %v2730_v14  ;;  %v2204_v14 = vor.u32 %v2688_v7, %v2201_v8  ;;  %v2696_v7 = vld [vmem:[%s3367_s17 + $0xb4] sm:$0xf]  ;;  %v2237_v8 = vld [vmem:[%s3367_s17 + $0xcc] sm:$0xf0] }
  0x7e   : > { %2819 = vmatpush.bf16.msra.mxu3 %v2738_v15  ;;  %1261 = vmatpush.bf16.msra.mxu1 %v2738_v15  ;;  %v2772_v15 = vld [vmem:[#allocation5 + $0x150] sm:$0xff] }
  0x80   : > { %1233 = vmatmul.bf16.vlgmr.msra.gmra.mxu2 %v2256_v25  ;;  %1213 = vmatmul.bf16.vlgmr.msra.gmra.mxu0 %v2144_v27  ;;  %v2227_v25 = vld [vmem:[%s3367_s17 + $0xa8] sm:$0xf]  ;;  %v2695_v27 = vld [vmem:[%s3367_s17 + $0xac] sm:$0xf] }
  0x81   : > { %1303 = vmatpush.bf16.msrb.mxu2 %v2753_v20  ;;  %1282 = vmatmul.bf16.vlgmr.msra.gmra.mxu3 %v2260_v26  ;;  %v2770_v20 = vld [vmem:[#allocation5 + $0x140] sm:$0xff] }
  0x82   : > { %1262 = vmatmul.bf16.vlgmr.msra.gmra.mxu1 %v2148_v29  ;;  %1352 = vmatpush.bf16.msrb.mxu3 %v2761_v30  ;;  %v2698_v26 = vld [vmem:[%s3367_s17 + $0xc0] sm:$0xf0]  ;;  %v2340_v29 = vor.u32 %v2726_v22, %v2339_v21  ;;  %v2344_v30 = vor.u32 %v2723_v23, %v2341_v24  ;;  %v2271_v21 = vld [vmem:[%s3367_s17 + $0xf0] sm:$0xf]  ;;  %v2707_v22 = vld [vmem:[%s3367_s17 + $0x108] sm:$0xf0] }
  0x83   : > { %1401 = vmatpush.bf16.msrb.mxu0 %v2769_v32  ;;  %1450 = vmatpush.bf16.msrb.mxu1 %v2777_v34  ;;  %v2678_v34 = vld [vmem:[%s3367_s17 + $0x20] sm:$0xf0]  ;;  %v2704_v23 = vld [vmem:[%s3367_s17 + $0xf4] sm:$0xf]  ;;  %v2273_v24 = vld [vmem:[%s3367_s17 + $0x10c] sm:$0xf0] }
  0x85   : > { %1304 = vmatpush.bf16.msrb.mxu2 %v2752_v28  ;;  %v2229_v28 = vld [vmem:[%s3367_s17 + $0xc4] sm:$0xf0] }
  0x86   : > { %1353 = vmatpush.bf16.msrb.mxu3 %v2760_v33  ;;  %v2232_v32 = vor.u32 %v2695_v27, %v2229_v28  ;;  %v2151_v33 = vld [vmem:[%s3367_s17 + $0x8] sm:$0xf]  ;;  %v3456_v27 = vld [vmem:[%s3747_s2] ss:$0 sm:$0xff]  ;;  %v2272_v28 = vor.u32 %v2707_v22, %v2271_v21 }
  0x87   : > { %1402 = vmatpush.bf16.msrb.mxu0 %v2768_v35  ;;  %1451 = vmatpush.bf16.msrb.mxu1 %v2776_v53  ;;  %v2675_v35 = vld [vmem:[%s3367_s17 + $0xc] sm:$0xf]  ;;  %v2152_v41 = vor.u32 %v2678_v34, %v2151_v33  ;;  %v2180_v53 = vor.u32 %v2685_v46, %v2179_v45  ;;  %v2714_v45 = vld [vmem:[%s3367_s17 + $0x140] sm:$0xf0] }
  0x89   : > { %1305 = vmatpush.bf16.msrb.mxu2 %v2751_v31  ;;  %v2228_v31 = vor.u32 %v2698_v26, %v2227_v25 }
  0x8a   : > { %1354 = vmatpush.bf16.msrb.mxu3 %v2759_v37  ;;  %v2159_v37 = vld [vmem:[%s3367_s17 + $0x10] sm:$0xf] }
  0x8b   : > { %1403 = vmatpush.bf16.msrb.mxu0 %v2767_v55  ;;  %1452 = vmatpush.bf16.msrb.mxu1 %v2775_v56  ;;  %v2160_v43 = vor.u32 %v2679_v38, %v2159_v37 }
  0x8d   : > { %1306 = vmatpush.bf16.msrb.mxu2 %v2750_v36  ;;  %v2153_v36 = vld [vmem:[%s3367_s17 + $0x24] sm:$0xf0] }
  0x8e   : > { %1355 = vmatpush.bf16.msrb.mxu3 %v2758_v47  ;;  %v2156_v42 = vor.u32 %v2675_v35, %v2153_v36  ;;  %v2682_v47 = vld [vmem:[%s3367_s17 + $0x44] sm:$0xf] }
  0x8f   : > { %1404 = vmatpush.bf16.msrb.mxu0 %v2766_v59  ;;  %1453 = vmatpush.bf16.msrb.mxu1 %v2774_v60  ;;  %v2689_v59 = vld [vmem:[%s3367_s17 + $0x7c] sm:$0xf]  ;;  %v2209_v60 = vld [vmem:[%s3367_s17 + $0x94] sm:$0xf0] }
  0x90   : > { %1238 = vmatmul.bf16.gmra.mxu2 %v2284_v48  ;;  %1218 = vmatmul.bf16.gmra.mxu0 %v2172_v50  ;;  %v2181_v48 = vld [vmem:[%s3367_s17 + $0x5c] sm:$0xf0]  ;;  %v2686_v50 = vld [vmem:[%s3367_s17 + $0x60] sm:$0xf0]  ;;  %v2212_v2 = vor.u32 %v2689_v59, %v2209_v60 }
  0x91   : > { %1307 = vmatpush.bf16.msrb.mxu2 %v2749_v44  ;;  %1287 = vmatmul.bf16.gmra.mxu3 %v2288_v49  ;;  %v2164_v44 = vor.u32 %v2676_v39, %v2161_v40  ;;  %v2187_v49 = vld [vmem:[%s3367_s17 + $0x48] sm:$0xf]  ;;  %v2291_v40 = vld [vmem:[%s3367_s17 + $0x120] sm:$0xf] }
  0x92   : > { %1267 = vmatmul.bf16.gmra.mxu1 %v2176_v51  ;;  %1356 = vmatpush.bf16.msrb.mxu3 %v2757_v54  ;;  %v2683_v51 = vld [vmem:[%s3367_s17 + $0x4c] sm:$0xf]  ;;  %v2184_v54 = vor.u32 %v2682_v47, %v2181_v48  ;;  %v2188_v55 = vor.u32 %v2686_v50, %v2187_v49  ;;  %v2301_v49 = vld [vmem:[%s3367_s17 + $0x144] sm:$0xf0] }
  0x93   : > { %1405 = vmatpush.bf16.msrb.mxu0 %v2765_v63  ;;  %1454 = vmatpush.bf16.msrb.mxu1 %v2773_v4  ;;  %v2690_v63 = vld [vmem:[%s3367_s17 + $0x84] sm:$0xf]  ;;  %v2711_v48 = vld [vmem:[%s3367_s17 + $0x12c] sm:$0xf] }
  0x94   : > { %v2220_v4 = vor.u32 %v2690_v63, %v2217_v0 }
  0x95   : > { %1308 = vmatpush.bf16.msrb.mxu2 %v2748_v52  ;;  %v2189_v52 = vld [vmem:[%s3367_s17 + $0x64] sm:$0xf0] }
  0x96   : > { %1357 = vmatpush.bf16.msrb.mxu3 %v2756_v58  ;;  %v2192_v56 = vor.u32 %v2683_v51, %v2189_v52  ;;  %v2692_v58 = vld [vmem:[%s3367_s17 + $0x90] sm:$0xf0] }
  0x97   : > { %1406 = vmatpush.bf16.msrb.mxu0 %v2764_v10  ;;  %1455 = vmatpush.bf16.msrb.mxu1 %v2772_v15  ;;  %v2700_v10 = vld [vmem:[%s3367_s17 + $0xd0] sm:$0xf0] }
  0x99   : > { %1309 = vmatpush.bf16.msrb.mxu2 %v2747_v57  ;;  %v2207_v57 = vld [vmem:[%s3367_s17 + $0x78] sm:$0xf] }
  0x9a   : > { %1358 = vmatpush.bf16.msrb.mxu3 %v2755_v62  ;;  %v2693_v62 = vld [vmem:[%s3367_s17 + $0x98] sm:$0xf0]  ;;  %v2208_v1 = vor.u32 %v2692_v58, %v2207_v57 }
  0x9b   : > { %1407 = vmatpush.bf16.msrb.mxu0 %v2763_v17  ;;  %1456 = vmatpush.bf16.msrb.mxu1 %v2771_v18  ;;  %v2263_v17 = vld [vmem:[%s3367_s17 + $0xe8] sm:$0xf]  ;;  %v2706_v18 = vld [vmem:[%s3367_s17 + $0x100] sm:$0xf0] }
  0x9c   : > { %v2264_v25 = vor.u32 %v2706_v18, %v2263_v17 }
  0x9d   : > { %1310 = vmatpush.bf16.msrb.mxu2 %v2746_v61  ;;  %v2215_v61 = vld [vmem:[%s3367_s17 + $0x80] sm:$0xf] }
  0x9e   : > { %1359 = vmatpush.bf16.msrb.mxu3 %v2754_v9  ;;  %v2216_v3 = vor.u32 %v2693_v62, %v2215_v61  ;;  %v2243_v9 = vld [vmem:[%s3367_s17 + $0xb8] sm:$0xf] }
  0x9f   : > { %1408 = vmatpush.bf16.msrb.mxu0 %v2762_v19  ;;  %1457 = vmatpush.bf16.msrb.mxu1 %v2770_v20  ;;  %v2244_v15 = vor.u32 %v2700_v10, %v2243_v9  ;;  %v2703_v19 = vld [vmem:[%s3367_s17 + $0xec] sm:$0xf]  ;;  %v2265_v20 = vld [vmem:[%s3367_s17 + $0x104] sm:$0xf0]  ;;  %v2718_v9 = vld [vmem:[%s3367_s17 + $0x164] sm:$0xf] }
  0xa0   : > { %1243 = vmatmul.bf16.gmra.mxu2 %v2312_v11  ;;  %1223 = vmatmul.bf16.gmra.mxu0 %v2200_v13  ;;  %v2697_v11 = vld [vmem:[%s3367_s17 + $0xbc] sm:$0xf]  ;;  %v2236_v13 = vor.u32 %v2699_v6, %v2235_v5  ;;  %v2268_v26 = vor.u32 %v2703_v19, %v2265_v20  ;;  %v2327_v5 = vld [vmem:[%s3367_s17 + $0x160] sm:$0xf] }
  0xa1   : > { %1292 = vmatmul.bf16.gmra.mxu3 %v2316_v12  ;;  %1506 = vmatpush.bf16.msra.mxu2 %v2778_v16  ;;  %v2245_v12 = vld [vmem:[%s3367_s17 + $0xd4] sm:$0xf0]  ;;  %v2721_v6 = vld [vmem:[%s3367_s17 + $0x178] sm:$0xf0]  ;;  %v2329_v10 = vld [vmem:[%s3367_s17 + $0x17c] sm:$0xf0] }
  0xa2   : > { %1272 = vmatmul.bf16.gmra.mxu1 %v2204_v14  ;;  %v2240_v14 = vor.u32 %v2696_v7, %v2237_v8  ;;  %v2248_v16 = vor.u32 %v2697_v11, %v2245_v12 }
  0xb0   : > { %1248 = vmatmul.bf16.gmra.mxu2 %v2340_v29  ;;  %1228 = vmatmul.bf16.gmra.mxu0 %v2228_v31 }
  0xb1   : > { %1297 = vmatmul.bf16.gmra.mxu3 %v2344_v30  ;;  %v2276_v30 = vor.u32 %v2704_v23, %v2273_v24 }
  0xb2   : > { %1277 = vmatmul.bf16.gmra.mxu1 %v2232_v32 }
  0xc0   : > { %1311 = vmatmul.bf16.vlgmr.msrb.gmra.mxu2 %v2152_v41  ;;  %1409 = vmatmul.bf16.vlgmr.msrb.gmra.mxu0 %v2160_v43  ;;  %v2713_v41 = vld [vmem:[%s3367_s17 + $0x138] sm:$0xf0]  ;;  %v2293_v43 = vld [vmem:[%s3367_s17 + $0x13c] sm:$0xf0] }
  0xc1   : > { %1360 = vmatmul.bf16.vlgmr.msrb.gmra.mxu3 %v2156_v42  ;;  %v2710_v42 = vld [vmem:[%s3367_s17 + $0x124] sm:$0xf]  ;;  %v2292_v51 = vor.u32 %v2713_v41, %v2291_v40  ;;  %v2357_v40 = vld [vmem:[%s3367_s17 + $0x1b4] sm:$0xf0] }
  0xc2   : > { %1458 = vmatmul.bf16.vlgmr.msrb.gmra.mxu1 %v2164_v44  ;;  %v2299_v44 = vld [vmem:[%s3367_s17 + $0x128] sm:$0xf]  ;;  %v2296_v52 = vor.u32 %v2710_v42, %v2293_v43 }
  0xd0   : > { %1316 = vmatmul.bf16.gmra.mxu2 %v2180_v53  ;;  %1414 = vmatmul.bf16.gmra.mxu0 %v2188_v55  ;;  %v2300_v53 = vor.u32 %v2714_v45, %v2299_v44  ;;  %v2304_v55 = vor.u32 %v2711_v48, %v2301_v49 }
  0xd1   : > { %1365 = vmatmul.bf16.gmra.mxu3 %v2184_v54 }
  0xd2   : > { %1463 = vmatmul.bf16.gmra.mxu1 %v2192_v56 }
  0xe0   : > { %1321 = vmatmul.bf16.gmra.mxu2 %v2208_v1  ;;  %1419 = vmatmul.bf16.gmra.mxu0 %v2216_v3  ;;  %v2319_v1 = vld [vmem:[%s3367_s17 + $0x158] sm:$0xf]  ;;  %v2717_v3 = vld [vmem:[%s3367_s17 + $0x15c] sm:$0xf] }
  0xe1   : > { %1370 = vmatmul.bf16.gmra.mxu3 %v2212_v2  ;;  %v2720_v2 = vld [vmem:[%s3367_s17 + $0x170] sm:$0xf0] }
  0xe2   : > { %1468 = vmatmul.bf16.gmra.mxu1 %v2220_v4  ;;  %v2321_v4 = vld [vmem:[%s3367_s17 + $0x174] sm:$0xf0]  ;;  %v2320_v12 = vor.u32 %v2720_v2, %v2319_v1 }
  0xe3   : > { %v2785_v2 = vld [vmem:[#allocation7 + $0x30] sm:$0xff] }
  0xf0   : > { %1326 = vmatmul.bf16.gmra.mxu2 %v2236_v13  ;;  %1424 = vmatmul.bf16.gmra.mxu0 %v2244_v15  ;;  %v2324_v13 = vor.u32 %v2717_v3, %v2321_v4 }
  0xf1   : > { %1375 = vmatmul.bf16.gmra.mxu3 %v2240_v14  ;;  %v2328_v14 = vor.u32 %v2721_v6, %v2327_v5  ;;  %v2195_v5 = vld [vmem:[%s3367_s17 + $0x50] sm:$0xf]  ;;  %v2687_v6 = vld [vmem:[%s3367_s17 + $0x68] sm:$0xf0] }
  0xf2   : > { %1473 = vmatmul.bf16.gmra.mxu1 %v2248_v16  ;;  %v2332_v16 = vor.u32 %v2718_v9, %v2329_v10  ;;  %v2196_v9 = vor.u32 %v2687_v6, %v2195_v5  ;;  %v2784_v10 = vld [vmem:[#allocation7 + $0x28] sm:$0xff]  ;;  %v2779_v5 = vld [vmem:[#allocation7] sm:$0xff] }
  0xfd   : > { %v1214_v29 = vpop.f32.mrf.mxu0 }
  0xfe   : > { %v1215_v31 = vadd.f32 %v3456_v27, %v1214_v29  ;;  %v2724_v29 = vld [vmem:[%s3367_s17 + $0x194] sm:$0xf] }
  0xff   : > { %v1263_v32 = vpop.f32.mrf.mxu1 }
 0x100   : > { %1331 = vmatmul.bf16.gmra.mxu2 %v2264_v25  ;;  %v3459_v33 = vadd.f32 %v1263_v32, %v1215_v31  ;;  %1429 = vmatmul.bf16.gmra.mxu0 %v2272_v28  ;;  %v2727_v28 = vld [vmem:[%s3367_s17 + $0x1a8] sm:$0xf0]  ;;  %v2355_v31 = vld [vmem:[%s3367_s17 + $0x198] sm:$0xf]  ;;  %v2728_v32 = vld [vmem:[%s3367_s17 + $0x1b0] sm:$0xf0] }
 0x101   : > { %1380 = vmatmul.bf16.gmra.mxu3 %v2268_v26  ;;  %v2347_v26 = vld [vmem:[%s3367_s17 + $0x190] sm:$0xf]  ;;  %v2356_v44 = vor.u32 %v2728_v32, %v2355_v31  ;;  %v2279_v31 = vld [vmem:[%s3367_s17 + $0xf8] sm:$0xf]  ;;  %v2708_v32 = vld [vmem:[%s3367_s17 + $0x110] sm:$0xf0] }
 0x102   : > { %1478 = vmatmul.bf16.gmra.mxu1 %v2276_v30  ;;  %v2349_v30 = vld [vmem:[%s3367_s17 + $0x1ac] sm:$0xf0]  ;;  %v2348_v42 = vor.u32 %v2727_v28, %v2347_v26  ;;  %v2782_v28 = vld [vmem:[#allocation7 + $0x18] sm:$0xff] }
 0x103   : > { %v1234_v34 = vpop.f32.mrf.mxu2  ;;  %v2352_v43 = vor.u32 %v2724_v29, %v2349_v30 }
 0x104   : > { %v1283_v35 = vpop.f32.mrf.mxu3  ;;  %v1235_v36 = vadd.f32 %v3456_v27, %v1234_v34 }
 0x105   : > { %v3464_v38 = vpop.f32.mrf.mxu0 }
 0x106   : > { %v3462_v37 = vadd.f32 %v1283_v35, %v1235_v36  ;;  %v2725_v36 = vld [vmem:[%s3367_s17 + $0x19c] sm:$0xf] }
 0x107   : > { %v3466_v39 = vpop.f32.mrf.mxu1 }
 0x10b   : > { %v1236_v46 = vpop.f32.mrf.mxu2 }
 0x10c   : > { %v3474_v47 = vpop.f32.mrf.mxu3  ;;  %v3479_v50 = vadd.f32 %v3456_v27, %v1236_v46  ;;  %v2360_v46 = vor.u32 %v2725_v36, %v2357_v40  ;;  %v2781_v36 = vld [vmem:[#allocation7 + $0x10] sm:$0xff] }
 0x10d   : > { %v1219_v54 = vpop.f32.mrf.mxu0 }
 0x10e   : > { %v1220_v56 = vadd.f32 %v3456_v27, %v1219_v54 }
 0x10f   : > { %v1268_v57 = vpop.f32.mrf.mxu1 }
 0x110   : > { %1336 = vmatmul.bf16.gmra.mxu2 %v2292_v51  ;;  %v3482_v58 = vadd.f32 %v1268_v57, %v1220_v56  ;;  %1434 = vmatmul.bf16.gmra.mxu0 %v2300_v53  ;;  %v2167_v57 = vld [vmem:[%s3367_s17 + $0x18] sm:$0xf] }
 0x111   : > { %1385 = vmatmul.bf16.gmra.mxu3 %v2296_v52  ;;  %v2786_v52 = vld [vmem:[#allocation7 + $0x38] sm:$0xff] }
 0x112   : > { %1483 = vmatmul.bf16.gmra.mxu1 %v2304_v55  ;;  %1640 = vmatpush.bf16.msra.mxu3 %v2786_v52  ;;  %v2780_v52 = vld [vmem:[#allocation7 + $0x8] sm:$0xff] }
 0x113   : > { %v1239_v59 = vpop.f32.mrf.mxu2 }
 0x114   : > { %v1288_v60 = vpop.f32.mrf.mxu3  ;;  %v1240_v61 = vadd.f32 %v3456_v27, %v1239_v59  ;;  %v2680_v59 = vld [vmem:[%s3367_s17 + $0x30] sm:$0xf0] }
 0x115   : > { %v3487_v63 = vpop.f32.mrf.mxu0  ;;  %v2168_v1 = vor.u32 %v2680_v59, %v2167_v57 }
 0x116   : > { %v3485_v62 = vadd.f32 %v1288_v60, %v1240_v61  ;;  %1641 = vmatpush.bf16.msra.mxu3 %v2785_v2 }
 0x117   : > { %v3489_v0 = vpop.f32.mrf.mxu1 }
 0x11a   : > { %1642 = vmatpush.bf16.msra.mxu3 %v2784_v10 }
 0x11b   : > { %v1241_v7 = vpop.f32.mrf.mxu2 }
 0x11c   : > { %v3497_v8 = vpop.f32.mrf.mxu3  ;;  %v3502_v11 = vadd.f32 %v3456_v27, %v1241_v7 }
 0x11d   : > { %v1224_v15 = vpop.f32.mrf.mxu0 }
 0x11e   : > { %v1225_v17 = vadd.f32 %v3456_v27, %v1224_v15  ;;  %v2694_v15 = vld [vmem:[%s3367_s17 + $0xa0] sm:$0xf0]  ;;  %v1291_v59 = vadd.f32 %v3497_v8, %v3502_v11 }
 0x11f   : > { %v1273_v18 = vpop.f32.mrf.mxu1 }
 0x120   : > { %1341 = vmatmul.bf16.gmra.mxu2 %v2320_v12  ;;  %v3505_v19 = vadd.f32 %v1273_v18, %v1225_v17  ;;  %1439 = vmatmul.bf16.gmra.mxu0 %v2328_v14  ;;  %v2223_v14 = vld [vmem:[%s3367_s17 + $0x88] sm:$0xf] }
 0x121   : > { %1390 = vmatmul.bf16.gmra.mxu3 %v2324_v13  ;;  %v2783_v17 = vld [vmem:[#allocation7 + $0x20] sm:$0xff] }
 0x122   : > { %1488 = vmatmul.bf16.gmra.mxu1 %v2332_v16  ;;  %v2224_v16 = vor.u32 %v2694_v15, %v2223_v14  ;;  %1643 = vmatpush.bf16.msra.mxu3 %v2783_v17  ;;  %v2363_v14 = vld [vmem:[%s3367_s17 + $0x1a0] sm:$0xf]  ;;  %v2729_v15 = vld [vmem:[%s3367_s17 + $0x1b8] sm:$0xf0] }
 0x123   : > { %v1244_v20 = vpop.f32.mrf.mxu2 }
 0x124   : > { %v1293_v21 = vpop.f32.mrf.mxu3  ;;  %v1245_v22 = vadd.f32 %v3456_v27, %v1244_v20 }
 0x125   : > { %v3510_v24 = vpop.f32.mrf.mxu0 }
 0x126   : > { %v3508_v23 = vadd.f32 %v1293_v21, %v1245_v22  ;;  %v2251_v21 = vld [vmem:[%s3367_s17 + $0xc0] sm:$0xf]  ;;  %v2701_v22 = vld [vmem:[%s3367_s17 + $0xd8] sm:$0xf0]  ;;  %1644 = vmatpush.bf16.msra.mxu3 %v2782_v28 }
 0x127   : > { %v3512_v25 = vpop.f32.mrf.mxu1  ;;  %v2252_v26 = vor.u32 %v2701_v22, %v2251_v21 }
 0x12a   : > { %1645 = vmatpush.bf16.msra.mxu3 %v2781_v36 }
 0x12b   : > { %v1246_v34 = vpop.f32.mrf.mxu2 }
 0x12c   : > { %v3520_v35 = vpop.f32.mrf.mxu3  ;;  %v3525_v41 = vadd.f32 %v3456_v27, %v1246_v34 }
 0x12d   : > { %v1229_v45 = vpop.f32.mrf.mxu0 }
 0x12e   : > { %v1230_v48 = vadd.f32 %v3456_v27, %v1229_v45  ;;  %v1286_v45 = vadd.f32 %v3474_v47, %v3479_v50  ;;  %1646 = vmatpush.bf16.msra.mxu3 %v2780_v52  ;;  %v2335_v47 = vld [vmem:[%s3367_s17 + $0x168] sm:$0xf]  ;;  %v2722_v50 = vld [vmem:[%s3367_s17 + $0x180] sm:$0xf0]  ;;  %v1296_v8 = vadd.f32 %v3520_v35, %v3525_v41 }
 0x12f   : > { %v1278_v49 = vpop.f32.mrf.mxu1  ;;  %v2336_v2 = vor.u32 %v2722_v50, %v2335_v47 }
 0x130   : > { %1346 = vmatmul.bf16.gmra.mxu2 %v2348_v42  ;;  %v1279_v51 = vadd.f32 %v1278_v49, %v1230_v48  ;;  %1444 = vmatmul.bf16.gmra.mxu0 %v2356_v44  ;;  %v2715_v44 = vld [vmem:[%s3367_s17 + $0x148] sm:$0xf0] }
 0x131   : > { %1395 = vmatmul.bf16.gmra.mxu3 %v2352_v43  ;;  %v2307_v43 = vld [vmem:[%s3367_s17 + $0x130] sm:$0xf] }
 0x132   : > { %1493 = vmatmul.bf16.gmra.mxu1 %v2360_v46  ;;  %v2308_v49 = vor.u32 %v2715_v44, %v2307_v43  ;;  %1647 = vmatpush.bf16.msra.mxu3 %v2779_v5 }
 0x133   : > { %v1249_v53 = vpop.f32.mrf.mxu2 }
 0x134   : > { %v1298_v54 = vpop.f32.mrf.mxu3  ;;  %v1250_v55 = vadd.f32 %v3456_v27, %v1249_v53 }
 0x135   : > { %v3578_v53 = vpop.f32.mrf.mxu0 }
 0x136   : > { %v3529_v56 = vadd.f32 %v1298_v54, %v1250_v55 }
 0x137   : > { %v3583_v55 = vpop.f32.mrf.mxu1 }
 0x13b   : > { %v1251_v60 = vpop.f32.mrf.mxu2 }
 0x13c   : > { %v3534_v61 = vadd.f32 %v3456_v27, %v1251_v60 }
 0x140   : > { %2561 = vmatmul.msk.bf16.vlgmr.msra.gmra.mxu2 %vm1180_vm0, %v2168_v1 }
 0x143   : > { %v1312_v3 = vpop.f32.mrf.mxu2 }
 0x144   : > { %v3538_v4 = vadd.f32 %v1312_v3, %v3459_v33  ;;  %v1410_v3 = vpop.f32.mrf.mxu0 }
 0x14b   : > { %v3542_v7 = vpop.f32.mrf.mxu2 }
 0x150   : > { %2562 = vmatmul.msk.bf16.gmra.mxu2 %vm1180_vm0, %v2196_v9 }
 0x153   : > { %v1317_v12 = vpop.f32.mrf.mxu2 }
 0x154   : > { %v3546_v13 = vadd.f32 %v1317_v12, %v3482_v58  ;;  %v1412_v12 = vpop.f32.mrf.mxu0 }
 0x15b   : > { %v3550_v33 = vpop.f32.mrf.mxu2 }
 0x15c   : > { %v1415_v22 = vpop.f32.mrf.mxu0 }
 0x160   : > { %2563 = vmatmul.msk.bf16.gmra.mxu2 %vm1180_vm0, %v2224_v16 }
 0x163   : > { %v1322_v18 = vpop.f32.mrf.mxu2 }
 0x164   : > { %v3554_v20 = vadd.f32 %v1322_v18, %v3505_v19  ;;  %v2280_v19 = vor.u32 %v2708_v32, %v2279_v31  ;;  %v2364_v18 = vor.u32 %v2729_v15, %v2363_v14  ;;  %v1417_v32 = vpop.f32.mrf.mxu0 }
 0x16b   : > { %v3558_v58 = vpop.f32.mrf.mxu2 }
 0x16c   : > { %v1420_v52 = vpop.f32.mrf.mxu0 }
 0x170   : > { %2564 = vmatmul.msk.bf16.gmra.mxu2 %vm1180_vm0, %v2252_v26 }
 0x173   : > { %v1327_v29 = vpop.f32.mrf.mxu2 }
 0x174   : > { %v3561_v30 = vadd.f32 %v1327_v29, %v1279_v51  ;;  %v1300_v51 = vpop.f32.mrf.mxu3  ;;  %v1217_v29 = vadd.f32 %v3456_v27, %v3464_v38  ;;  %v1222_v38 = vadd.f32 %v3456_v27, %v3487_v63  ;;  %v1422_v5 = vpop.f32.mrf.mxu0 }
 0x175   : > { %v1301_v41 = vadd.f32 %v1300_v51, %v3534_v61 }
 0x176   : > { %v1266_v35 = vadd.f32 %v3466_v39, %v1217_v29  ;;  %v1271_v47 = vadd.f32 %v3489_v0, %v1222_v38  ;;  %v1227_v0 = vadd.f32 %v3456_v27, %v3510_v24 }
 0x17b   : > { %v3565_v34 = vpop.f32.mrf.mxu2 }
 0x17c   : > { %v1361_v57 = vpop.f32.mrf.mxu3 }
 0x17d   : > { %v1362_v44 = vadd.f32 %v1361_v57, %v3538_v4  ;;  %v1320_v57 = vadd.f32 %v3550_v33, %v1271_v47  ;;  %v1425_v33 = vpop.f32.mrf.mxu0 }
 0x180   : > { %2565 = vmatmul.msk.bf16.gmra.mxu2 %vm1180_vm0, %v2280_v19 }
 0x183   : > { %v1332_v40 = vpop.f32.mrf.mxu2 }
 0x184   : > { %v3569_v42 = vadd.f32 %v1332_v40, %v3462_v37  ;;  %v1363_v6 = vpop.f32.mrf.mxu3  ;;  %v1315_v40 = vadd.f32 %v3542_v7, %v1266_v35 }
 0x18b   : > { %v1334_v46 = vpop.f32.mrf.mxu2 }
 0x18c   : > { %v3575_v48 = vadd.f32 %v1334_v46, %v1286_v45  ;;  %v1366_v21 = vpop.f32.mrf.mxu3  ;;  %v1364_v45 = vadd.f32 %v1363_v6, %v1315_v40 }
 0x18d   : > { %v1367_v6 = vadd.f32 %v1366_v21, %v3546_v13 }
 0x18e   : > { %v1413_v39 = vadd.f32 %v1412_v12, %v1364_v45 }
 0x18f   : > { %v1416_v14 = vadd.f32 %v1415_v22, %v1367_v6 }
 0x190   : > { %2566 = vmatmul.msk.bf16.gmra.mxu2 %vm1180_vm0, %v2308_v49  ;;  %v1411_v49 = vadd.f32 %v1410_v3, %v1362_v44 }
 0x193   : > { %v1337_v37 = vpop.f32.mrf.mxu2 }
 0x194   : > { %v3581_v54 = vadd.f32 %v1337_v37, %v3485_v62  ;;  %v1459_v62 = vpop.f32.mrf.mxu1  ;;  %v1368_v31 = vpop.f32.mrf.mxu3  ;;  %v2794_v37 = vld [vmem:[#allocation8 + $0x38] sm:$0xff] }
 0x195   : > { %v1460_v61 = vadd.f32 %v1459_v62, %v1411_v49  ;;  %1781 = vmatpush.bf16.msra.mxu0 %v2794_v37 }
 0x19b   : > { %v1339_v60 = vpop.f32.mrf.mxu2 }
 0x19c   : > { %v3589_v1 = vadd.f32 %v1339_v60, %v1291_v59  ;;  %v1461_v11 = vpop.f32.mrf.mxu1 }
 0x19d   : > { %v1462_v50 = vadd.f32 %v1461_v11, %v1413_v39  ;;  %v2793_v11 = vld [vmem:[#allocation8 + $0x30] sm:$0xff] }
 0x19e   : > { %1782 = vmatpush.bf16.msra.mxu0 %v2793_v11 }
 0x1a0   : > { %2567 = vmatmul.msk.bf16.gmra.mxu2 %vm1180_vm0, %v2336_v2 }
 0x1a3   : > { %v1342_v9 = vpop.f32.mrf.mxu2 }
 0x1a4   : > { %v3593_v10 = vadd.f32 %v1342_v9, %v3508_v23  ;;  %v1464_v28 = vpop.f32.mrf.mxu1  ;;  %v1369_v9 = vadd.f32 %v1368_v31, %v1320_v57 }
 0x1ab   : > { %v1344_v16 = vpop.f32.mrf.mxu2 }
 0x1ac   : > { %v3599_v17 = vadd.f32 %v1344_v16, %v1296_v8  ;;  %v1466_v43 = vpop.f32.mrf.mxu1  ;;  %v1418_v8 = vadd.f32 %v1417_v32, %v1369_v9  ;;  %v1465_v16 = vadd.f32 %v1464_v28, %v1416_v14  ;;  %v1427_v28 = vpop.f32.mrf.mxu0 }
 0x1b0   : > { %2568 = vmatmul.msk.bf16.gmra.mxu2 %vm1180_vm0, %v2364_v18  ;;  %v1276_v18 = vadd.f32 %v3512_v25, %v1227_v0  ;;  %v1232_v25 = vadd.f32 %v3456_v27, %v3578_v53 }
 0x1b2   : > { %v1325_v35 = vadd.f32 %v3558_v58, %v1276_v18  ;;  %v1281_v39 = vadd.f32 %v3583_v55, %v1232_v25  ;;  %v2791_v55 = vld [vmem:[#allocation8 + $0x20] sm:$0xff] }
 0x1b3   : > { %v1347_v26 = vpop.f32.mrf.mxu2 }
 0x1b4   : > { %v3603_v23 = vadd.f32 %v1347_v26, %v3529_v56  ;;  %v1371_v56 = vpop.f32.mrf.mxu3  ;;  %v1469_v51 = vpop.f32.mrf.mxu1  ;;  %v1467_v26 = vadd.f32 %v1466_v43, %v1418_v8 }
 0x1b5   : > { %v1372_v40 = vadd.f32 %v1371_v56, %v3554_v20  ;;  %v1430_v47 = vpop.f32.mrf.mxu0 }
 0x1b7   : > { %v1421_v45 = vadd.f32 %v1420_v52, %v1372_v40 }
 0x1b9   : > { %v1470_v38 = vadd.f32 %v1469_v51, %v1421_v45 }
 0x1bb   : > { %v1349_v19 = vpop.f32.mrf.mxu2 }
 0x1bc   : > { %v3609_v36 = vadd.f32 %v1349_v19, %v1301_v41  ;;  %v1373_v59 = vpop.f32.mrf.mxu3  ;;  %v1471_v62 = vpop.f32.mrf.mxu1 }
 0x1bd   : > { %v1374_v32 = vadd.f32 %v1373_v59, %v1325_v35 }
 0x1bf   : > { %v1423_v43 = vadd.f32 %v1422_v5, %v1374_v32 }
 0x1c1   : > { %v1472_v37 = vadd.f32 %v1471_v62, %v1423_v43 }
 0x1c3   : > { %v1508_v46 = vpop.f32.mrf.mxu2 }
 0x1c4   : > { %v1509_v7 = vadd.f32 %v1508_v46, %v1460_v61  ;;  %v1376_v15 = vpop.f32.mrf.mxu3  ;;  %v1474_v31 = vpop.f32.mrf.mxu1  ;;  %v2792_v46 = vld [vmem:[#allocation8 + $0x28] sm:$0xff] }
 0x1c5   : > { %1783 = vmatpush.bf16.msra.mxu0 %v2792_v46  ;;  %v1377_v59 = vadd.f32 %v1376_v15, %v3561_v30 }
 0x1c6   : > { %v1548_v2 = vmax.f32 %v1509_v7, 0.0 }
 0x1c7   : > { %v1426_v57 = vadd.f32 %v1425_v33, %v1377_v59  ;;  %v2788_v59 = vld [vmem:[#allocation8 + $0x8] sm:$0xff] }
 0x1c9   : > { %v1475_v5 = vadd.f32 %v1474_v31, %v1426_v57  ;;  %1784 = vmatpush.bf16.msra.mxu0 %v2791_v55 }
 0x1cb   : > { %v1510_v60 = vpop.f32.mrf.mxu2 }
 0x1cc   : > { %v1511_v4 = vadd.f32 %v1510_v60, %v1462_v50  ;;  %v1378_v19 = vpop.f32.mrf.mxu3  ;;  %v1476_v49 = vpop.f32.mrf.mxu1  ;;  %v1330_v50 = vadd.f32 %v3565_v34, %v1281_v39 }
 0x1ce   : > { %v1549_v3 = vmax.f32 %v1511_v4, 0.0  ;;  %v1379_v60 = vadd.f32 %v1378_v19, %v1330_v50 }
 0x1d0   : > { %v1564_v63 = vpack.c.bf16 %v1549_v3, %v1548_v2  ;;  %v1428_v2 = vadd.f32 %v1427_v28, %v1379_v60  ;;  %v1432_v3 = vpop.f32.mrf.mxu0 }
 0x1d2   : > { %1648 = vmatmul.bf16.vlgmr.msra.gmra.mxu3 %v1564_v63  ;;  %v1477_v6 = vadd.f32 %v1476_v49, %v1428_v2  ;;  %v2789_v49 = vld [vmem:[#allocation8 + $0x10] sm:$0xff] }
 0x1d3   : > { %v1513_v12 = vpop.f32.mrf.mxu2 }
 0x1d4   : > { %v1514_v29 = vadd.f32 %v1513_v12, %v1465_v16  ;;  %v1381_v58 = vpop.f32.mrf.mxu3  ;;  %v1479_v53 = vpop.f32.mrf.mxu1 }
 0x1d5   : > { %v1382_v15 = vadd.f32 %v1381_v58, %v3569_v42 }
 0x1d6   : > { %v1550_v41 = vmax.f32 %v1514_v29, 0.0  ;;  %v2790_v29 = vld [vmem:[#allocation8 + $0x18] sm:$0xff] }
 0x1d7   : > { %v1431_v33 = vadd.f32 %v1430_v47, %v1382_v15  ;;  %1785 = vmatpush.bf16.msra.mxu0 %v2790_v29 }
 0x1d8   : > { %v1435_v8 = vpop.f32.mrf.mxu0 }
 0x1db   : > { %v1515_v13 = vpop.f32.mrf.mxu2  ;;  %1786 = vmatpush.bf16.msra.mxu0 %v2789_v49  ;;  %v2800_v49 = vld [vmem:[#allocation10 + $0x28] sm:$0xff] }
 0x1dc   : > { %v1516_v21 = vadd.f32 %v1515_v13, %v1467_v26  ;;  %v1383_v51 = vpop.f32.mrf.mxu3  ;;  %v1481_v9 = vpop.f32.mrf.mxu1 }
 0x1dd   : > { %v1384_v11 = vadd.f32 %v1383_v51, %v3575_v48  ;;  %v2787_v51 = vld [vmem:[#allocation8] sm:$0xff] }
 0x1de   : > { %v1551_v22 = vmax.f32 %v1516_v21, 0.0  ;;  %v1480_v21 = vadd.f32 %v1479_v53, %v1431_v33 }
 0x1df   : > { %v1433_v26 = vadd.f32 %v1432_v3, %v1384_v11  ;;  %1787 = vmatpush.bf16.msra.mxu0 %v2788_v59 }
 0x1e0   : > { %v1565_v24 = vpack.c.bf16 %v1551_v22, %v1550_v41  ;;  %v1437_v41 = vpop.f32.mrf.mxu0 }
 0x1e1   : > { %v1482_v31 = vadd.f32 %v1481_v9, %v1433_v26 }
 0x1e2   : > { %1653 = vmatmul.bf16.gmra.mxu3 %v1565_v24 }
 0x1e3   : > { %v1518_v44 = vpop.f32.mrf.mxu2  ;;  %1788 = vmatpush.bf16.msra.mxu0 %v2787_v51 }
 0x1e4   : > { %v1519_v61 = vadd.f32 %v1518_v44, %v1470_v38  ;;  %v1386_v12 = vpop.f32.mrf.mxu3  ;;  %v1484_v18 = vpop.f32.mrf.mxu1 }
 0x1e5   : > { %v1387_v32 = vadd.f32 %v1386_v12, %v3581_v54 }
 0x1e6   : > { %v1552_v7 = vmax.f32 %v1519_v61, 0.0 }
 0x1e7   : > { %v1436_v25 = vadd.f32 %v1435_v8, %v1387_v32  ;;  %v2801_v32 = vld [vmem:[#allocation10 + $0x30] sm:$0xff] }
 0x1e8   : > { %v1440_v43 = vpop.f32.mrf.mxu0 }
 0x1e9   : > { %v1485_v38 = vadd.f32 %v1484_v18, %v1436_v25 }
 0x1eb   : > { %v1520_v20 = vpop.f32.mrf.mxu2 }
 0x1ec   : > { %v1521_v56 = vadd.f32 %v1520_v20, %v1472_v37  ;;  %v1388_v13 = vpop.f32.mrf.mxu3  ;;  %v1486_v24 = vpop.f32.mrf.mxu1 }
 0x1ed   : > { %v1389_v44 = vadd.f32 %v1388_v13, %v3589_v1 }
 0x1ee   : > { %v1553_v52 = vmax.f32 %v1521_v56, 0.0 }
 0x1ef   : > { %v1438_v46 = vadd.f32 %v1437_v41, %v1389_v44 }
 0x1f0   : > { %v1566_v27 = vpack.c.bf16 %v1553_v52, %v1552_v7  ;;  %v1442_v50 = vpop.f32.mrf.mxu0 }
 0x1f1   : > { %v1487_v39 = vadd.f32 %v1486_v24, %v1438_v46 }
 0x1f2   : > { %1658 = vmatmul.bf16.gmra.mxu3 %v1566_v27 }
 0x1f3   : > { %v1523_v4 = vpop.f32.mrf.mxu2 }
 0x1f4   : > { %v1524_v63 = vadd.f32 %v1523_v4, %v1475_v5  ;;  %v1391_v28 = vpop.f32.mrf.mxu3  ;;  %v1489_v58 = vpop.f32.mrf.mxu1 }
 0x1f5   : > { %v1392_v7 = vadd.f32 %v1391_v28, %v3593_v10 }
 0x1f6   : > { %v1554_v14 = vmax.f32 %v1524_v63, 0.0 }
 0x1f7   : > { %v1441_v60 = vadd.f32 %v1440_v43, %v1392_v7 }
 0x1f8   : > { %v1445_v55 = vpop.f32.mrf.mxu0 }
 0x1f9   : > { %v1490_v2 = vadd.f32 %v1489_v58, %v1441_v60 }
 0x1fb   : > { %v1525_v34 = vpop.f32.mrf.mxu2 }
 0x1fc   : > { %v1526_v62 = vadd.f32 %v1525_v34, %v1477_v6  ;;  %v1393_v61 = vpop.f32.mrf.mxu3  ;;  %v1491_v27 = vpop.f32.mrf.mxu1 }
 0x1fd   : > { %v1394_v52 = vadd.f32 %v1393_v61, %v3599_v17 }
 0x1fe   : > { %v1555_v30 = vmax.f32 %v1526_v62, 0.0 }
 0x1ff   : > { %v1443_v57 = vadd.f32 %v1442_v50, %v1394_v52 }
 0x200   : > { %v1567_v0 = vpack.c.bf16 %v1555_v30, %v1554_v14  ;;  %v1447_v30 = vpop.f32.mrf.mxu0 }
 0x201   : > { %v1492_v3 = vadd.f32 %v1491_v27, %v1443_v57 }
 0x202   : > { %1663 = vmatmul.bf16.gmra.mxu3 %v1567_v0 }
 0x203   : > { %v1528_v16 = vpop.f32.mrf.mxu2 }
 0x204   : > { %v1529_v35 = vadd.f32 %v1528_v16, %v1480_v21  ;;  %v1396_v4 = vpop.f32.mrf.mxu3  ;;  %v1494_v10 = vpop.f32.mrf.mxu1 }
 0x205   : > { %v1397_v62 = vadd.f32 %v1396_v4, %v3603_v23 }
 0x206   : > { %v1556_v40 = vmax.f32 %v1529_v35, 0.0  ;;  %v2802_v35 = vld [vmem:[#allocation10 + $0x38] sm:$0xff] }
 0x207   : > { %v1446_v0 = vadd.f32 %v1445_v55, %v1397_v62  ;;  %1922 = vmatpush.bf16.msra.mxu1 %v2802_v35 }
 0x209   : > { %v1495_v16 = vadd.f32 %v1494_v10, %v1446_v0 }
 0x20b   : > { %v1530_v22 = vpop.f32.mrf.mxu2  ;;  %1923 = vmatpush.bf16.msra.mxu1 %v2801_v32 }
 0x20c   : > { %v1531_v19 = vadd.f32 %v1530_v22, %v1482_v31  ;;  %v1398_v17 = vpop.f32.mrf.mxu3  ;;  %v1496_v11 = vpop.f32.mrf.mxu1 }
 0x20d   : > { %v1399_v14 = vadd.f32 %v1398_v17, %v3609_v36  ;;  %v3639_v36 = vld [vmem:[%s3749_s4] ss:$0 sm:$0xff] }
 0x20e   : > { %v1557_v42 = vmax.f32 %v1531_v19, 0.0 }
 0x20f   : > { %v1448_v8 = vadd.f32 %v1447_v30, %v1399_v14  ;;  %1924 = vmatpush.bf16.msra.mxu1 %v2800_v49  ;;  %v2795_v14 = vld [vmem:[#allocation10] sm:$0xff] }
 0x210   : > { %v1568_v48 = vpack.c.bf16 %v1557_v42, %v1556_v40 }
 0x211   : > { %v1497_v33 = vadd.f32 %v1496_v11, %v1448_v8 }
 0x212   : > { %1668 = vmatmul.bf16.gmra.mxu3 %v1568_v48 }
 0x213   : > { %v1533_v45 = vpop.f32.mrf.mxu2 }
 0x214   : > { %v1534_v37 = vadd.f32 %v1533_v45, %v1485_v38 }
 0x216   : > { %v1558_v47 = vmax.f32 %v1534_v37, 0.0 }
 0x21b   : > { %v1535_v20 = vpop.f32.mrf.mxu2 }
 0x21c   : > { %v1536_v56 = vadd.f32 %v1535_v20, %v1487_v39 }
 0x21e   : > { %v1559_v54 = vmax.f32 %v1536_v56, 0.0 }
 0x220   : > { %v1569_v1 = vpack.c.bf16 %v1559_v54, %v1558_v47  ;;  %v2799_v47 = vld [vmem:[#allocation10 + $0x20] sm:$0xff] }
 0x221   : > { %1925 = vmatpush.bf16.msra.mxu1 %v2799_v47 }
 0x222   : > { %1673 = vmatmul.bf16.gmra.mxu3 %v1569_v1 }
 0x223   : > { %v1538_v53 = vpop.f32.mrf.mxu2 }
 0x224   : > { %v1539_v5 = vadd.f32 %v1538_v53, %v1490_v2  ;;  %v2798_v53 = vld [vmem:[#allocation10 + $0x18] sm:$0xff] }
 0x225   : > { %1926 = vmatpush.bf16.msra.mxu1 %v2798_v53 }
 0x226   : > { %v1560_v9 = vmax.f32 %v1539_v5, 0.0  ;;  %v2797_v5 = vld [vmem:[#allocation10 + $0x10] sm:$0xff] }
 0x229   : > { %1927 = vmatpush.bf16.msra.mxu1 %v2797_v5 }
 0x22b   : > { %v1540_v6 = vpop.f32.mrf.mxu2 }
 0x22c   : > { %v1541_v63 = vadd.f32 %v1540_v6, %v1492_v3 }
 0x22e   : > { %v1561_v34 = vmax.f32 %v1541_v63, 0.0 }
 0x230   : > { %v1570_v12 = vpack.c.bf16 %v1561_v34, %v1560_v9 }
 0x232   : > { %1678 = vmatmul.bf16.gmra.mxu3 %v1570_v12  ;;  %v2796_v12 = vld [vmem:[#allocation10 + $0x8] sm:$0xff] }
 0x233   : > { %v1543_v15 = vpop.f32.mrf.mxu2  ;;  %1928 = vmatpush.bf16.msra.mxu1 %v2796_v12 }
 0x234   : > { %v1544_v18 = vadd.f32 %v1543_v15, %v1495_v16 }
 0x236   : > { %v1562_v13 = vmax.f32 %v1544_v18, 0.0 }
 0x237   : > { %1929 = vmatpush.bf16.msra.mxu1 %v2795_v14 }
 0x23b   : > { %v1545_v26 = vpop.f32.mrf.mxu2 }
 0x23c   : > { %v1546_v29 = vadd.f32 %v1545_v26, %v1497_v33 }
 0x23e   : > { %v1563_v21 = vmax.f32 %v1546_v29, 0.0 }
 0x240   : > { %v1571_v31 = vpack.c.bf16 %v1563_v21, %v1562_v13 }
 0x242   : > { %1683 = vmatmul.bf16.gmra.mxu3 %v1571_v31 }
 0x255   : > { %v1649_v23 = vpop.f32.mrf.mxu3 }
 0x256   : > { %v1650_v41 = vadd.f32 %v3639_v36, %v1649_v23 }
 0x258   : > { %v1689_v40 = vmax.f32 %v1650_v41, 0.0  ;;  %v2911_v41 = vld [vmem:[%s3751_s6] ss:$0 sm:$0xff] }
 0x25d   : > { %v1651_v22 = vpop.f32.mrf.mxu3 }
 0x25e   : > { %v1652_v19 = vadd.f32 %v3639_v36, %v1651_v22 }
 0x260   : > { %v1690_v42 = vmax.f32 %v1652_v19, 0.0 }
 0x262   : > { %v1705_v24 = vpack.c.bf16 %v1690_v42, %v1689_v40 }
 0x264   : > { %1789 = vmatmul.bf16.vlgmr.msra.gmra.mxu0 %v1705_v24 }
 0x265   : > { %v1654_v48 = vpop.f32.mrf.mxu3 }
 0x266   : > { %v1655_v28 = vadd.f32 %v3639_v36, %v1654_v48 }
 0x268   : > { %v1691_v25 = vmax.f32 %v1655_v28, 0.0 }
 0x26d   : > { %v1656_v44 = vpop.f32.mrf.mxu3 }
 0x26e   : > { %v1657_v45 = vadd.f32 %v3639_v36, %v1656_v44 }
 0x270   : > { %v1692_v43 = vmax.f32 %v1657_v45, 0.0 }
 0x272   : > { %v1706_v46 = vpack.c.bf16 %v1692_v43, %v1691_v25 }
 0x274   : > { %1794 = vmatmul.bf16.gmra.mxu0 %v1706_v46 }
 0x275   : > { %v1659_v38 = vpop.f32.mrf.mxu3 }
 0x276   : > { %v1660_v58 = vadd.f32 %v3639_v36, %v1659_v38 }
 0x278   : > { %v1693_v61 = vmax.f32 %v1660_v58, 0.0 }
 0x27d   : > { %v1661_v39 = vpop.f32.mrf.mxu3 }
 0x27e   : > { %v1662_v37 = vadd.f32 %v3639_v36, %v1661_v39 }
 0x280   : > { %v1694_v20 = vmax.f32 %v1662_v37, 0.0 }
 0x282   : > { %v1707_v56 = vpack.c.bf16 %v1694_v20, %v1693_v61 }
 0x284   : > { %1799 = vmatmul.bf16.gmra.mxu0 %v1707_v56 }
 0x285   : > { %v1664_v54 = vpop.f32.mrf.mxu3 }
 0x286   : > { %v1665_v50 = vadd.f32 %v3639_v36, %v1664_v54 }
 0x288   : > { %v1695_v52 = vmax.f32 %v1665_v50, 0.0 }
 0x28d   : > { %v1666_v7 = vpop.f32.mrf.mxu3 }
 0x28e   : > { %v1667_v1 = vadd.f32 %v3639_v36, %v1666_v7 }
 0x290   : > { %v1696_v59 = vmax.f32 %v1667_v1, 0.0 }
 0x292   : > { %v1708_v27 = vpack.c.bf16 %v1696_v59, %v1695_v52 }
 0x294   : > { %1804 = vmatmul.bf16.gmra.mxu0 %v1708_v27 }
 0x295   : > { %v1669_v60 = vpop.f32.mrf.mxu3 }
 0x296   : > { %v1670_v51 = vadd.f32 %v3639_v36, %v1669_v60 }
 0x298   : > { %v1697_v2 = vmax.f32 %v1670_v51, 0.0 }
 0x29d   : > { %v1671_v4 = vpop.f32.mrf.mxu3 }
 0x29e   : > { %v1672_v57 = vadd.f32 %v3639_v36, %v1671_v4 }
 0x2a0   : > { %v1698_v55 = vmax.f32 %v1672_v57, 0.0 }
 0x2a2   : > { %v1709_v3 = vpack.c.bf16 %v1698_v55, %v1697_v2 }
 0x2a4   : > { %1809 = vmatmul.bf16.gmra.mxu0 %v1709_v3 }
 0x2a5   : > { %v1674_v6 = vpop.f32.mrf.mxu3 }
 0x2a6   : > { %v1675_v63 = vadd.f32 %v3639_v36, %v1674_v6 }
 0x2a8   : > { %v1699_v34 = vmax.f32 %v1675_v63, 0.0 }
 0x2ad   : > { %v1676_v10 = vpop.f32.mrf.mxu3 }
 0x2ae   : > { %v1677_v9 = vadd.f32 %v3639_v36, %v1676_v10 }
 0x2b0   : > { %v1700_v17 = vmax.f32 %v1677_v9, 0.0 }
 0x2b2   : > { %v1710_v62 = vpack.c.bf16 %v1700_v17, %v1699_v34 }
 0x2b4   : > { %1814 = vmatmul.bf16.gmra.mxu0 %v1710_v62 }
 0x2b5   : > { %v1679_v30 = vpop.f32.mrf.mxu3 }
 0x2b6   : > { %v1680_v15 = vadd.f32 %v3639_v36, %v1679_v30 }
 0x2b8   : > { %v1701_v11 = vmax.f32 %v1680_v15, 0.0 }
 0x2bd   : > { %v1681_v0 = vpop.f32.mrf.mxu3 }
 0x2be   : > { %v1682_v8 = vadd.f32 %v3639_v36, %v1681_v0 }
 0x2c0   : > { %v1702_v16 = vmax.f32 %v1682_v8, 0.0 }
 0x2c2   : > { %v1711_v33 = vpack.c.bf16 %v1702_v16, %v1701_v11 }
 0x2c4   : > { %1819 = vmatmul.bf16.gmra.mxu0 %v1711_v33 }
 0x2c5   : > { %v1684_v18 = vpop.f32.mrf.mxu3 }
 0x2c6   : > { %v1685_v26 = vadd.f32 %v3639_v36, %v1684_v18  ;;  %v2912_v18 = vld [vmem:[%s3753_s8] ss:$0 sm:$0xff] }
 0x2c8   : > { %v1703_v21 = vmax.f32 %v1685_v26, 0.0 }
 0x2cd   : > { %v1686_v29 = vpop.f32.mrf.mxu3 }
 0x2ce   : > { %v1687_v13 = vadd.f32 %v3639_v36, %v1686_v29 }
 0x2d0   : > { %v1704_v31 = vmax.f32 %v1687_v13, 0.0 }
 0x2d2   : > { %v1712_v35 = vpack.c.bf16 %v1704_v31, %v1703_v21 }
 0x2d4   : > { %1824 = vmatmul.bf16.gmra.mxu0 %v1712_v35 }
 0x2e1   : > { %v1790_v23 = vpop.f32.mrf.mxu0 }
 0x2e2   : > { %v1791_v22 = vadd.f32 %v2911_v41, %v1790_v23 }
 0x2e4   : > { %v1830_v42 = vmax.f32 %v1791_v22, 0.0 }
 0x2e9   : > { %v1792_v19 = vpop.f32.mrf.mxu0 }
 0x2ea   : > { %v1793_v40 = vadd.f32 %v2911_v41, %v1792_v19 }
 0x2ec   : > { %v1831_v24 = vmax.f32 %v1793_v40, 0.0 }
 0x2ee   : > { %v1846_v32 = vpack.c.bf16 %v1831_v24, %v1830_v42 }
 0x2f0   : > { %1930 = vmatmul.bf16.vlgmr.msra.gmra.mxu1 %v1846_v32 }
 0x2f1   : > { %v1795_v48 = vpop.f32.mrf.mxu0 }
 0x2f2   : > { %v1796_v28 = vadd.f32 %v2911_v41, %v1795_v48 }
 0x2f4   : > { %v1832_v45 = vmax.f32 %v1796_v28, 0.0 }
 0x2f9   : > { %v1797_v44 = vpop.f32.mrf.mxu0 }
 0x2fa   : > { %v1798_v36 = vadd.f32 %v2911_v41, %v1797_v44 }
 0x2fc   : > { %v1833_v25 = vmax.f32 %v1798_v36, 0.0 }
 0x2fe   : > { %v1847_v43 = vpack.c.bf16 %v1833_v25, %v1832_v45 }
 0x300   : > { %1935 = vmatmul.bf16.gmra.mxu1 %v1847_v43 }
 0x301   : > { %v1800_v46 = vpop.f32.mrf.mxu0 }
 0x302   : > { %v1801_v49 = vadd.f32 %v2911_v41, %v1800_v46 }
 0x304   : > { %v1834_v39 = vmax.f32 %v1801_v49, 0.0 }
 0x309   : > { %v1802_v38 = vpop.f32.mrf.mxu0 }
 0x30a   : > { %v1803_v58 = vadd.f32 %v2911_v41, %v1802_v38 }
 0x30c   : > { %v1835_v37 = vmax.f32 %v1803_v58, 0.0 }
 0x30e   : > { %v1848_v61 = vpack.c.bf16 %v1835_v37, %v1834_v39 }
 0x310   : > { %1940 = vmatmul.bf16.gmra.mxu1 %v1848_v61 }
 0x311   : > { %v1805_v20 = vpop.f32.mrf.mxu0 }
 0x312   : > { %v1806_v56 = vadd.f32 %v2911_v41, %v1805_v20 }
 0x314   : > { %v1836_v50 = vmax.f32 %v1806_v56, 0.0 }
 0x319   : > { %v1807_v47 = vpop.f32.mrf.mxu0 }
 0x31a   : > { %v1808_v54 = vadd.f32 %v2911_v41, %v1807_v47 }
 0x31c   : > { %v1837_v7 = vmax.f32 %v1808_v54, 0.0 }
 0x31e   : > { %v1849_v1 = vpack.c.bf16 %v1837_v7, %v1836_v50 }
 0x320   : > { %1945 = vmatmul.bf16.gmra.mxu1 %v1849_v1 }
 0x321   : > { %v1810_v52 = vpop.f32.mrf.mxu0 }
 0x322   : > { %v1811_v59 = vadd.f32 %v2911_v41, %v1810_v52 }
 0x324   : > { %v1838_v60 = vmax.f32 %v1811_v59, 0.0 }
 0x329   : > { %v1812_v27 = vpop.f32.mrf.mxu0 }
 0x32a   : > { %v1813_v53 = vadd.f32 %v2911_v41, %v1812_v27 }
 0x32c   : > { %v1839_v51 = vmax.f32 %v1813_v53, 0.0 }
 0x32e   : > { %v1850_v4 = vpack.c.bf16 %v1839_v51, %v1838_v60 }
 0x330   : > { %1950 = vmatmul.bf16.gmra.mxu1 %v1850_v4 }
 0x331   : > { %v1815_v57 = vpop.f32.mrf.mxu0 }
 0x332   : > { %v1816_v2 = vadd.f32 %v2911_v41, %v1815_v57 }
 0x334   : > { %v1840_v5 = vmax.f32 %v1816_v2, 0.0 }
 0x339   : > { %v1817_v55 = vpop.f32.mrf.mxu0 }
 0x33a   : > { %v1818_v3 = vadd.f32 %v2911_v41, %v1817_v55 }
 0x33c   : > { %v1841_v6 = vmax.f32 %v1818_v3, 0.0 }
 0x33e   : > { %v1851_v63 = vpack.c.bf16 %v1841_v6, %v1840_v5 }
 0x340   : > { %1955 = vmatmul.bf16.gmra.mxu1 %v1851_v63 }
 0x341   : > { %v1820_v10 = vpop.f32.mrf.mxu0 }
 0x342   : > { %v1821_v9 = vadd.f32 %v2911_v41, %v1820_v10 }
 0x344   : > { %v1842_v62 = vmax.f32 %v1821_v9, 0.0 }
 0x349   : > { %v1822_v34 = vpop.f32.mrf.mxu0 }
 0x34a   : > { %v1823_v17 = vadd.f32 %v2911_v41, %v1822_v34 }
 0x34c   : > { %v1843_v12 = vmax.f32 %v1823_v17, 0.0 }
 0x34e   : > { %v1852_v14 = vpack.c.bf16 %v1843_v12, %v1842_v62 }
 0x350   : > { %1960 = vmatmul.bf16.gmra.mxu1 %v1852_v14 }
 0x351   : > { %v1825_v30 = vpop.f32.mrf.mxu0 }
 0x352   : > { %v1826_v15 = vadd.f32 %v2911_v41, %v1825_v30 }
 0x354   : > { %v1844_v11 = vmax.f32 %v1826_v15, 0.0 }
 0x359   : > { %v1827_v0 = vpop.f32.mrf.mxu0 }
 0x35a   : > { %v1828_v8 = vadd.f32 %v2911_v41, %v1827_v0 }
 0x35c   : > { %v1845_v16 = vmax.f32 %v1828_v8, 0.0 }
 0x35e   : > { %v1853_v33 = vpack.c.bf16 %v1845_v16, %v1844_v11 }
 0x360   : > { %1965 = vmatmul.bf16.gmra.mxu1 %v1853_v33 }
 0x36d   : > { %v1931_v26 = vpop.f32.mrf.mxu1 }
 0x36e   : > { %v1932_v29 = vadd.f32 %v2912_v18, %v1931_v26 }
 0x370   : > { %1971 = vst [vmem:[%s3664_s16] sm:$0xff] %v1932_v29 }
 0x375   : > { %v1933_v13 = vpop.f32.mrf.mxu1 }
 0x376   : > { %v1934_v21 = vadd.f32 %v2912_v18, %v1933_v13 }
 0x378   : > { %1972 = vst [vmem:[%s3664_s16 + $0x8] sm:$0xff] %v1934_v21 }
 0x37d   : > { %v1936_v31 = vpop.f32.mrf.mxu1 }
 0x37e   : > { %v1937_v35 = vadd.f32 %v2912_v18, %v1936_v31 }
 0x380   : > { %1973 = vst [vmem:[%s3664_s16 + $0x10] sm:$0xff] %v1937_v35 }
 0x385   : > { %v1938_v23 = vpop.f32.mrf.mxu1 }
 0x386   : > { %v1939_v41 = vadd.f32 %v2912_v18, %v1938_v23 }
 0x388   : > { %1974 = vst [vmem:[%s3664_s16 + $0x18] sm:$0xff] %v1939_v41 }
 0x38d   : > { %v1941_v22 = vpop.f32.mrf.mxu1 }
 0x38e   : > { %v1942_v19 = vadd.f32 %v2912_v18, %v1941_v22 }
 0x390   : > { %1975 = vst [vmem:[%s3664_s16 + $0x20] sm:$0xff] %v1942_v19 }
 0x395   : > { %v1943_v40 = vpop.f32.mrf.mxu1 }
 0x396   : > { %v1944_v42 = vadd.f32 %v2912_v18, %v1943_v40 }
 0x398   : > { %1976 = vst [vmem:[%s3664_s16 + $0x28] sm:$0xff] %v1944_v42 }
 0x39d   : > { %v1946_v24 = vpop.f32.mrf.mxu1 }
 0x39e   : > { %v1947_v32 = vadd.f32 %v2912_v18, %v1946_v24 }
 0x3a0   : > { %1977 = vst [vmem:[%s3664_s16 + $0x30] sm:$0xff] %v1947_v32 }
 0x3a5   : > { %v1948_v48 = vpop.f32.mrf.mxu1 }
 0x3a6   : > { %v1949_v28 = vadd.f32 %v2912_v18, %v1948_v48 }
 0x3a8   : > { %1978 = vst [vmem:[%s3664_s16 + $0x38] sm:$0xff] %v1949_v28 }
 0x3ad   : > { %v1951_v44 = vpop.f32.mrf.mxu1 }
 0x3ae   : > { %v1952_v36 = vadd.f32 %v2912_v18, %v1951_v44 }
 0x3b0   : > { %1979 = vst [vmem:[%s3664_s16 + $0x40] sm:$0xff] %v1952_v36 }
 0x3b5   : > { %v1953_v45 = vpop.f32.mrf.mxu1 }
 0x3b6   : > { %v1954_v25 = vadd.f32 %v2912_v18, %v1953_v45 }
 0x3b8   : > { %1980 = vst [vmem:[%s3664_s16 + $0x48] sm:$0xff] %v1954_v25 }
 0x3bd   : > { %v1956_v43 = vpop.f32.mrf.mxu1 }
 0x3be   : > { %v1957_v46 = vadd.f32 %v2912_v18, %v1956_v43 }
 0x3c0   : > { %1981 = vst [vmem:[%s3664_s16 + $0x50] sm:$0xff] %v1957_v46 }
 0x3c5   : > { %v1958_v49 = vpop.f32.mrf.mxu1 }
 0x3c6   : > { %v1959_v38 = vadd.f32 %v2912_v18, %v1958_v49 }
 0x3c8   : > { %1982 = vst [vmem:[%s3664_s16 + $0x58] sm:$0xff] %v1959_v38 }
 0x3cd   : > { %v1961_v58 = vpop.f32.mrf.mxu1 }
 0x3ce   : > { %v1962_v39 = vadd.f32 %v2912_v18, %v1961_v58 }
 0x3d0   : > { %1983 = vst [vmem:[%s3664_s16 + $0x60] sm:$0xff] %v1962_v39 }
 0x3d5   : > { %v1963_v37 = vpop.f32.mrf.mxu1 }
 0x3d6   : > { %v1964_v61 = vadd.f32 %v2912_v18, %v1963_v37 }
 0x3d8   : > { %1984 = vst [vmem:[%s3664_s16 + $0x68] sm:$0xff] %v1964_v61 }
 0x3dd   : > { %v1966_v20 = vpop.f32.mrf.mxu1 }
 0x3de   : > { %v1967_v56 = vadd.f32 %v2912_v18, %v1966_v20 }
 0x3e0   : > { %1985 = vst [vmem:[%s3664_s16 + $0x70] sm:$0xff] %v1967_v56 }
 0x3e4   : > { %1994 = sbr.rel (!%p3273_p11) target bundleno = 1032 (0x408), region = 80 }
 0x3e5   : > { %v1968_v47 = vpop.f32.mrf.mxu1 }
 0x3e6   : > { %v1969_v54 = vadd.f32 %v2912_v18, %v1968_v47 }
 0x3e8   : > { %1986 = vst [vmem:[%s3664_s16 + $0x78] sm:$0xff] %v1969_v54 }
 0x3e9   : > { %s3798_s15 = smov (!%p1997_p6, %s1996_s15), 16 }
 0x3ea   : > { %s2667_s5 = sshll.u32 %s3798_s15, 3 }
 0x3eb   : > { %s2000_s18 = ssub.s32 128, %s2667_s5 }
 0x3ec   : > { %s2001_s28 = sshll.u32 %s2000_s18, 4 }
 0x3ed   : > { %2002 = vsyncadd %s1988_s26, %s2001_s28  ;;  %p3691_p7 = scmp.ne.s32.totalorder %s2667_s5, 0  ;;  %s2803_s29 = sshll.u32 %s3242_s13, 7 }
 0x3ee   : > { %s3783_s23 = sld [smem:[#allocation22_spill]]  ;;  %s2007_s19 = sshll.u32 %s3664_s16, 4  ;;  %s3700_s19 = int_to_ptr.vmem [resolvable:$true] %s2007_s19 }
 0x3ef   : > { %s2671_s27 = sshll.u32 %s3798_s15, 7  ;;  %s3072_s1 = sshra.s32 %s3700_s19, 4  ;;  %s3073_s1 = int_to_ptr.vmem [resolvable:$true] %s3072_s1 }
 0x3f0   : > { %s3074_s24 = sshrl.u32 %s2671_s27, 4  ;;  %s3168_s13 = smov [#allocation11]  }
 0x3f1   : > { %s3079_s14 = scalar_lea.vmem %s3073_s1, %s3074_s24  ;;  %s3083_s30 = scalar_lea.vmem %s3168_s13, 256 }
 0x3f2   : > { %p3080_p11 = scmp.ne.s32.totalorder %s3073_s1, %s3079_s14  ;;  %p3085_p0 = scmp.lt.s32.totalorder %s3083_s30, %s3079_s14 }
 0x3f4   : > { %s2005_s9 = scalar_lea.hbm %s3783_s23, %s2803_s29  ;;  %p3081_p10 = pnand %p3080_p11, %p3691_p7 }
 0x3f5   : > { %s2009_s25 = sshll.u32 %s2005_s9, 4  ;;  %s3702_s25 = int_to_ptr.hbm [resolvable:$true] %s2009_s25 }
 0x3f6   : > { %p3082_p1 = pneg %p3081_p10 }
 0x3f8   : > { %p3087_p3 = pnand %p3085_p0, %p3082_p1 }
 0x3fa   : > { %3090 = shalt.err (!%p3087_p3)
}
 0x3fb   : > { %s3091_s16 = sshra.s32 %s3702_s25, 4  ;;  %s3102_s29 = scalar_lea.hbm %s3783_s23, 200  ;;  %s3092_s16 = int_to_ptr.hbm [resolvable:$true] %s3091_s16 }
 0x3fc   : > { %s3098_s5 = scalar_lea.hbm %s3092_s16, %s3074_s24  ;;  %p3103_p4 = scmp.lt.s32.totalorder %s3092_s16, %s3783_s23 }
 0x3fd   : > { %p3099_p5 = scmp.ne.s32.totalorder %s3092_s16, %s3098_s5  ;;  %p3104_p12 = scmp.lt.s32.totalorder %s3102_s29, %s3098_s5 }
 0x3ff   : > { %p3100_p8 = pnand %p3099_p5, %p3691_p7  ;;  %p3105_p13 = por %p3104_p12, %p3103_p4 }
 0x401   : > { %p3101_p9 = pneg %p3100_p8 }
 0x403   : > { %p3106_p2 = pnand %p3105_p13, %p3101_p9 }
 0x405   : > { %3109 = shalt.err (!%p3106_p2)
}
 0x406   : > { %s3169_s9 = smov 128   ;;  %s3170_s1 = smov 8  }
 0x407   : > { %2015 = dma.vmem_to_hbm [thread:$0]  (%p3691_p7), %s3700_s19, %s2671_s27, %s3702_s25, %s1988_s26, %s3169_s9, %s3169_s9, %s3170_s1  }
 0x408 PF: > { %s3784_s24 = sld [smem:[#allocation16_spill]]  ;;  %p3787_p11 = scmp.ge.s32.totalorder %s3157_s12, 2 }
 0x409   : > { %s3785_s14 = sld [smem:[#allocation19_spill]] }
 0x40e   : > { %s2024_s13 = sand.u32 1, %s3784_s24  }
 0x40f   : > { %p3786_p6 = scmp.ne.s32.totalorder %s3785_s14, 0  ;;  %s2025_s30 = scalar_lea.sflag [#allocation4], %s2024_s13 }
 0x411   : > { %p2855_p10 = pnand %p3787_p11, %p3786_p6 }
 0x413   : > { %p2856_p1 = pneg %p2855_p10 }
 0x415   : > { %3140 = dma.done.wait (%p2856_p1), %s2025_s30, 2048  }
 0x416   : > { %3142 = vsyncadd (%p2856_p1), %s2025_s30, 4294965248  ;;  %s3788_s12 = sld [smem:[#allocation17_spill]]  ;;  %s3790_s30 = smov %s3149_s10 }
 0x417   : > { %s3789_s21 = sld [smem:[#allocation18_spill]]  ;;  %s3791_s10 = smov %s3153_s11 }
 0x41c   : > { %p24_p0 = scmp.ge.s32.totalorder %s3788_s12, 4  }
 0x41d   : > { %s3792_s11 = smov %s3789_s21 }
 0x41e   :  { %26 = sbr.rel (!%p24_p0) target bundleno = 11 (0xb), region = 117 }
 0x423   :  { %2031 = vsyncpa [#allocation3], 1 }
 0x424   :  { %2033 = vsyncpa [#allocation3 + $0x1], 1 }
 0x425   :  { %2034 = vsyncpa [#allocation6], 1 }
 0x426   :  { %2035 = vsyncpa [#allocation9], 1 }
 0x427   :  { %2036 = vsyncpa [#allocation4], 1 }
 0x428   :  { %2038 = vsyncpa [#allocation4 + $0x1], 1 }

</bundles_post_ra>
